<compile_context>
chip_gen: v5e
topology: v5e:2x2
jax: 0.10.0
libtpu: 0.0.40
codegen_flags: <defaults>
</compile_context>

<pallas_src>
import numpy as np
import jax
import jax.numpy as jnp
from jax import lax
from jax.experimental import pallas as pl
from jax.experimental.pallas import tpu as pltpu


# ----------------------------------------------------------------------------
# Pallas kernel: entire FWPCell forward for one TB-row batch tile.
# ----------------------------------------------------------------------------
def fwp_kernel(x_ref, prev_ref, we_ref, be_ref, wlq_ref, blq_ref, zw_ref, bp_ref,
               res_ref, params_ref):
    x = x_ref[...]                                    # [TB, s_dim]
    TB, s_dim = x.shape
    n_qubits = we_ref.shape[1]
    q_depth = wlq_ref.shape[1] - n_qubits
    dim = zw_ref.shape[1]                             # 2 ** n_qubits
    inv_sqrt2 = 1.0 / np.sqrt(2.0)

    # Row-invariant bit masks of the amplitude (lane) index; broadcast over sublanes
    # inside jnp.where so mask pressure is independent of the batch-tile size.
    lane = lax.broadcasted_iota(jnp.int32, (1, dim), 1)
    masks = [((lane >> j) & 1) == 1 for j in range(n_qubits)]

    # ---- slow program: encoder + fused (qubit_idx | layer_idx) head ----------
    enc = jnp.dot(x, we_ref[...], preferred_element_type=jnp.float32) + be_ref[...]
    lq = jnp.dot(enc, wlq_ref[...], preferred_element_type=jnp.float32) + blq_ref[...]
    qi = lq[:, :n_qubits]                             # [TB, n_qubits]
    li = lq[:, n_qubits:]                             # [TB, q_depth]

    # ---- fast-weight circuit params, hoisted out of the depth loop -----------
    # params[:, k*n + j] = li[:, k] * qi[:, j] + prev[:, k*n + j]
    p_all = jnp.concatenate([li[:, k:k + 1] * qi for k in range(q_depth)], axis=1)
    p_all = p_all + prev_ref[...]                     # [TB, q_depth*n_qubits]
    params_ref[...] = p_all                           # single lane-dense store
    c_all = jnp.cos(0.5 * p_all)                      # 2 EUP calls total
    s_all = jnp.sin(0.5 * p_all)

    # ---- quantum circuit ------------------------------------------------------
    # H layer on |0..0> followed by RY(x_j) on wire j is a separable product state:
    #   psi[i] = (1/sqrt2)^n * prod_j ( (c_j + s_j) if bit_j(i)==1 else (c_j - s_j) )
    cx = jnp.cos(0.5 * x)
    sx = jnp.sin(0.5 * x)
    state = jnp.full((TB, dim), float(inv_sqrt2 ** n_qubits), dtype=jnp.float32)
    for j in range(s_dim):                            # wires >= s_dim get no encoding RY
        a0 = cx[:, j:j + 1] - sx[:, j:j + 1]
        a1 = cx[:, j:j + 1] + sx[:, j:j + 1]
        state = state * jnp.where(masks[j], a1, a0)

    def ry_layer(state, c, s):
        # RY(theta_j) on wire j:  psi' = cos*psi + sin*rot,
        #   rot[i] = psi[i - 2^j] if bit_j(i)==1 else -psi[i + 2^j]
        for j in range(n_qubits):
            fwd = pltpu.roll(state, 2 ** j, axis=1)           # psi[i - 2^j]
            bwd = pltpu.roll(state, dim - 2 ** j, axis=1)     # psi[i + 2^j]
            rot = jnp.where(masks[j], fwd, -bwd)
            state = c[:, j:j + 1] * state + s[:, j:j + 1] * rot
        return state

    def entangling_layer(state):
        # CNOT(c,t): new[k] = old[k ^ (bit_c(k) << t)]
        pairs = [(i, i + 1) for i in range(0, n_qubits - 1, 2)] + \
                [(i, i + 1) for i in range(1, n_qubits - 1, 2)]
        for (c, t) in pairs:
            fwd = pltpu.roll(state, 2 ** t, axis=1)           # old[k - 2^t]
            bwd = pltpu.roll(state, dim - 2 ** t, axis=1)     # old[k + 2^t]
            flipped = jnp.where(masks[t], fwd, bwd)           # old[k ^ 2^t]
            state = jnp.where(masks[c], flipped, state)
        return state

    for k in range(q_depth):
        state = entangling_layer(state)
        state = ry_layer(state,
                         c_all[:, k * n_qubits:(k + 1) * n_qubits],
                         s_all[:, k * n_qubits:(k + 1) * n_qubits])

    # ---- measurement + post processing (folded: res = probs @ (Z @ w_post) + b) ----
    probs = state * state
    res_ref[...] = jnp.sum(probs * zw_ref[...], axis=1, keepdims=True) + bp_ref[...]


# ----------------------------------------------------------------------------
# Glue / wrapper
# ----------------------------------------------------------------------------
def fwp_cell_forward(x, prev, w_enc, b_enc, w_li, b_li, w_qi, b_qi,
                     w_post, b_post, z):
    B, s_dim = x.shape
    q_depth, n_qubits = w_li.shape[1], w_qi.shape[1]
    P = q_depth * n_qubits
    dim = 2 ** n_qubits
    assert s_dim <= n_qubits, "encoding RY layer needs s_dim <= n_qubits"

    # Fold PauliZ observables and post-processing weight into one [1, 2^n] row.
    zw = (z @ w_post).reshape(1, dim).astype(jnp.float32)
    # Pack the two slow-program heads into one weight (qubit_idx first, lane-aligned).
    w_lq = jnp.concatenate([w_qi, w_li], axis=1)          # [n_qubits, n_qubits+q_depth]
    b_lq = jnp.concatenate([b_qi, b_li], axis=1)          # [1, n_qubits+q_depth]

    def round_up(v, m):
        return ((v + m - 1) // m) * m

    # Batch tile: up to 128 rows per program (f32 sublane tile is 8 rows).
    TB = min(128, round_up(B, 8))
    Bp = round_up(B, TB)
    pad = Bp - B
    x_p = jnp.pad(x, ((0, pad), (0, 0)))
    prev_flat = jnp.pad(prev.reshape(B, P), ((0, pad), (0, 0)))

    grid = (Bp // TB,)

    def tiled(last):
        return pl.BlockSpec((TB, last), lambda i: (i, 0))

    def resident(arr):
        # Constant block index -> fetched once, stays VMEM-resident across the grid.
        return pl.BlockSpec(arr.shape, lambda i: (0, 0))

    res, params_flat = pl.pallas_call(
        fwp_kernel,
        grid=grid,
        out_shape=(jax.ShapeDtypeStruct((Bp, 1), jnp.float32),
                   jax.ShapeDtypeStruct((Bp, P), jnp.float32)),
        in_specs=[tiled(s_dim), tiled(P),
                  resident(w_enc), resident(b_enc),
                  resident(w_lq), resident(b_lq),
                  resident(zw), resident(b_post)],
        out_specs=(tiled(1), tiled(P)),
        compiler_params=pltpu.CompilerParams(dimension_semantics=("parallel",)),
    )(x_p, prev_flat, w_enc, b_enc, w_lq, b_lq, zw, b_post)

    return res[:B], params_flat[:B].reshape(B, q_depth, n_qubits)


# ----------------------------------------------------------------------------
# Constants for the independent pure-JAX reference (matmul formulation)
# ----------------------------------------------------------------------------
def build_gate_matrices(n_qubits, a_dim):
    dim = 2 ** n_qubits
    A = np.array([[0.0, -1.0], [1.0, 0.0]], dtype=np.float64)        # RY generator (real)
    g_t = np.zeros((n_qubits, dim, dim), dtype=np.float32)
    for j in range(n_qubits):
        G = np.kron(np.eye(2 ** (n_qubits - 1 - j)), np.kron(A, np.eye(2 ** j)))
        g_t[j] = G.T.astype(np.float32)                              # state @ g_t[j] == G @ psi

    f = np.arange(dim)
    pairs = [(i, i + 1) for i in range(0, n_qubits - 1, 2)] + \
            [(i, i + 1) for i in range(1, n_qubits - 1, 2)]
    for (c, t) in pairs:
        bitc = (f >> c) & 1
        f = f ^ (bitc << t)
    p_t = np.zeros((dim, dim), dtype=np.float32)
    p_t[np.arange(dim), f] = 1.0                                     # state @ p_t == P @ psi

    idx = np.arange(dim)
    z = np.zeros((dim, a_dim), dtype=np.float32)
    for p in range(a_dim):
        z[:, p] = 1.0 - 2.0 * ((idx >> p) & 1)
    return jnp.asarray(g_t), jnp.asarray(p_t), jnp.asarray(z)


def reference_forward(x, prev, w_enc, b_enc, w_li, b_li, w_qi, b_qi,
                      w_post, b_post, g_t, p_t, z):
    B = x.shape[0]
    dim = p_t.shape[0]
    enc = x @ w_enc + b_enc
    li = enc @ w_li + b_li
    qi = enc @ w_qi + b_qi
    params = li[:, :, None] * qi[:, None, :] + prev
    state = jnp.full((B, dim), 1.0 / (dim ** 0.5), jnp.float32)

    def ry(state, angles):
        for j in range(angles.shape[1]):
            half = angles[:, j:j + 1] * 0.5
            state = jnp.cos(half) * state + jnp.sin(half) * (state @ g_t[j])
        return state

    state = ry(state, x)
    for k in range(params.shape[1]):
        state = state @ p_t
        state = ry(state, params[:, k, :])
    expvals = (state * state) @ z
    return expvals @ w_post + b_post, params


def linear_params(key, fan_in, fan_out):
    kw, kb = jax.random.split(key)
    bound = 1.0 / np.sqrt(fan_in)
    w = jax.random.uniform(kw, (fan_in, fan_out), jnp.float32, -bound, bound)
    b = jax.random.uniform(kb, (1, fan_out), jnp.float32, -bound, bound)
    return w, b


if __name__ == "__main__":
    B = 4
    S_DIM = 8          # equals n_qubits: batch_item feeds the RY encoding layer
    A_DIM = 4          # number of measured qubits (quantum-net outputs)
    N_QUBITS = 8       # latent_dim in the torch module
    Q_DEPTH = 2

    key = jax.random.PRNGKey(0)
    k_x, k_prev, k_enc, k_li, k_qi, k_post = jax.random.split(key, 6)

    x = jax.random.normal(k_x, (B, S_DIM), jnp.float32)
    prev = 0.1 * jax.random.normal(k_prev, (B, Q_DEPTH, N_QUBITS), jnp.float32)

    w_enc, b_enc = linear_params(k_enc, S_DIM, N_QUBITS)
    w_li, b_li = linear_params(k_li, N_QUBITS, Q_DEPTH)
    w_qi, b_qi = linear_params(k_qi, N_QUBITS, N_QUBITS)
    w_post, b_post = linear_params(k_post, A_DIM, 1)

    g_t, p_t, z = build_gate_matrices(N_QUBITS, A_DIM)

    res, out_params = fwp_cell_forward(x, prev, w_enc, b_enc, w_li, b_li,
                                       w_qi, b_qi, w_post, b_post, z)
    jax.block_until_ready((res, out_params))

    with jax.default_matmul_precision("float32"):
        res_exp, params_exp = reference_forward(x, prev, w_enc, b_enc, w_li, b_li,
                                                w_qi, b_qi, w_post, b_post,
                                                g_t, p_t, z)
    assert res.shape == (B, 1) and out_params.shape == (B, Q_DEPTH, N_QUBITS)
    assert jnp.allclose(res, res_exp, rtol=1e-4, atol=1e-4)
    assert jnp.allclose(out_params, params_exp, rtol=1e-4, atol=1e-4)
    print("KERNEL_OK")
</pallas_src>

<mosaic_0001>
module attributes {stable_mosaic.version = 11 : i64} {
  func.func @fwp_kernel(%arg0: i32, %arg1: memref<8x8xf32, #tpu.memory_space<vmem>>, %arg2: memref<8x16xf32, #tpu.memory_space<vmem>>, %arg3: memref<8x8xf32, #tpu.memory_space<vmem>>, %arg4: memref<1x8xf32, #tpu.memory_space<vmem>>, %arg5: memref<8x10xf32, #tpu.memory_space<vmem>>, %arg6: memref<1x10xf32, #tpu.memory_space<vmem>>, %arg7: memref<1x256xf32, #tpu.memory_space<vmem>>, %arg8: memref<1x1xf32, #tpu.memory_space<vmem>>, %arg9: memref<8x1xf32, #tpu.memory_space<vmem>>, %arg10: memref<8x16xf32, #tpu.memory_space<vmem>>) attributes {dimension_semantics = [#tpu.dimension_semantics<parallel>], iteration_bounds = array<i64: 1>, scalar_prefetch = 0 : i64, scratch_operands = 0 : i64, tpu.core_type = #tpu.core_type<tc>, window_params = [{transform_indices = @transform_0, window_bounds = array<i64: 8, 8>}, {transform_indices = @transform_1, window_bounds = array<i64: 8, 16>}, {pipeline_mode = #tpu.pipeline_mode<synchronous>, transform_indices = @transform_2, window_bounds = array<i64: 8, 8>}, {pipeline_mode = #tpu.pipeline_mode<synchronous>, transform_indices = @transform_3, window_bounds = array<i64: 1, 8>}, {pipeline_mode = #tpu.pipeline_mode<synchronous>, transform_indices = @transform_4, window_bounds = array<i64: 8, 10>}, {pipeline_mode = #tpu.pipeline_mode<synchronous>, transform_indices = @transform_5, window_bounds = array<i64: 1, 10>}, {pipeline_mode = #tpu.pipeline_mode<synchronous>, transform_indices = @transform_6, window_bounds = array<i64: 1, 256>}, {pipeline_mode = #tpu.pipeline_mode<synchronous>, transform_indices = @transform_7, window_bounds = array<i64: 1, 1>}, {transform_indices = @transform_8, window_bounds = array<i64: 8, 1>}, {transform_indices = @transform_9, window_bounds = array<i64: 8, 16>}]} {
    %c0 = arith.constant 0 : index
    %c0_0 = arith.constant 0 : index
    %0 = vector.load %arg1[%c0, %c0_0] : memref<8x8xf32, #tpu.memory_space<vmem>>, vector<8x8xf32>
    %1 = tpu.iota {dimensions = array<i32: 1>} : vector<1x256xi32>
    %c0_i32 = arith.constant 0 : i32
    %2 = vector.broadcast %c0_i32 : i32 to vector<1x256xi32>
    %3 = arith.shrsi %1, %2 : vector<1x256xi32>
    %c1_i32 = arith.constant 1 : i32
    %4 = vector.broadcast %c1_i32 : i32 to vector<1x256xi32>
    %5 = arith.andi %3, %4 : vector<1x256xi32>
    %c1_i32_1 = arith.constant 1 : i32
    %6 = vector.broadcast %c1_i32_1 : i32 to vector<1x256xi32>
    %7 = arith.cmpi eq, %5, %6 : vector<1x256xi32>
    %c1_i32_2 = arith.constant 1 : i32
    %8 = vector.broadcast %c1_i32_2 : i32 to vector<1x256xi32>
    %9 = arith.shrsi %1, %8 : vector<1x256xi32>
    %c1_i32_3 = arith.constant 1 : i32
    %10 = vector.broadcast %c1_i32_3 : i32 to vector<1x256xi32>
    %11 = arith.andi %9, %10 : vector<1x256xi32>
    %c1_i32_4 = arith.constant 1 : i32
    %12 = vector.broadcast %c1_i32_4 : i32 to vector<1x256xi32>
    %13 = arith.cmpi eq, %11, %12 : vector<1x256xi32>
    %c2_i32 = arith.constant 2 : i32
    %14 = vector.broadcast %c2_i32 : i32 to vector<1x256xi32>
    %15 = arith.shrsi %1, %14 : vector<1x256xi32>
    %c1_i32_5 = arith.constant 1 : i32
    %16 = vector.broadcast %c1_i32_5 : i32 to vector<1x256xi32>
    %17 = arith.andi %15, %16 : vector<1x256xi32>
    %c1_i32_6 = arith.constant 1 : i32
    %18 = vector.broadcast %c1_i32_6 : i32 to vector<1x256xi32>
    %19 = arith.cmpi eq, %17, %18 : vector<1x256xi32>
    %c3_i32 = arith.constant 3 : i32
    %20 = vector.broadcast %c3_i32 : i32 to vector<1x256xi32>
    %21 = arith.shrsi %1, %20 : vector<1x256xi32>
    %c1_i32_7 = arith.constant 1 : i32
    %22 = vector.broadcast %c1_i32_7 : i32 to vector<1x256xi32>
    %23 = arith.andi %21, %22 : vector<1x256xi32>
    %c1_i32_8 = arith.constant 1 : i32
    %24 = vector.broadcast %c1_i32_8 : i32 to vector<1x256xi32>
    %25 = arith.cmpi eq, %23, %24 : vector<1x256xi32>
    %c4_i32 = arith.constant 4 : i32
    %26 = vector.broadcast %c4_i32 : i32 to vector<1x256xi32>
    %27 = arith.shrsi %1, %26 : vector<1x256xi32>
    %c1_i32_9 = arith.constant 1 : i32
    %28 = vector.broadcast %c1_i32_9 : i32 to vector<1x256xi32>
    %29 = arith.andi %27, %28 : vector<1x256xi32>
    %c1_i32_10 = arith.constant 1 : i32
    %30 = vector.broadcast %c1_i32_10 : i32 to vector<1x256xi32>
    %31 = arith.cmpi eq, %29, %30 : vector<1x256xi32>
    %c5_i32 = arith.constant 5 : i32
    %32 = vector.broadcast %c5_i32 : i32 to vector<1x256xi32>
    %33 = arith.shrsi %1, %32 : vector<1x256xi32>
    %c1_i32_11 = arith.constant 1 : i32
    %34 = vector.broadcast %c1_i32_11 : i32 to vector<1x256xi32>
    %35 = arith.andi %33, %34 : vector<1x256xi32>
    %c1_i32_12 = arith.constant 1 : i32
    %36 = vector.broadcast %c1_i32_12 : i32 to vector<1x256xi32>
    %37 = arith.cmpi eq, %35, %36 : vector<1x256xi32>
    %c6_i32 = arith.constant 6 : i32
    %38 = vector.broadcast %c6_i32 : i32 to vector<1x256xi32>
    %39 = arith.shrsi %1, %38 : vector<1x256xi32>
    %c1_i32_13 = arith.constant 1 : i32
    %40 = vector.broadcast %c1_i32_13 : i32 to vector<1x256xi32>
    %41 = arith.andi %39, %40 : vector<1x256xi32>
    %c1_i32_14 = arith.constant 1 : i32
    %42 = vector.broadcast %c1_i32_14 : i32 to vector<1x256xi32>
    %43 = arith.cmpi eq, %41, %42 : vector<1x256xi32>
    %c7_i32 = arith.constant 7 : i32
    %44 = vector.broadcast %c7_i32 : i32 to vector<1x256xi32>
    %45 = arith.shrsi %1, %44 : vector<1x256xi32>
    %c1_i32_15 = arith.constant 1 : i32
    %46 = vector.broadcast %c1_i32_15 : i32 to vector<1x256xi32>
    %47 = arith.andi %45, %46 : vector<1x256xi32>
    %c1_i32_16 = arith.constant 1 : i32
    %48 = vector.broadcast %c1_i32_16 : i32 to vector<1x256xi32>
    %49 = arith.cmpi eq, %47, %48 : vector<1x256xi32>
    %c0_17 = arith.constant 0 : index
    %c0_18 = arith.constant 0 : index
    %50 = vector.load %arg3[%c0_17, %c0_18] : memref<8x8xf32, #tpu.memory_space<vmem>>, vector<8x8xf32>
    %cst = arith.constant dense<0.000000e+00> : vector<8x8xf32>
    %51 = tpu.matmul %0, %50, %cst {dimension_numbers = #tpu.dot_dimension_numbers<[1], [0], [0], [1], [0, 0, 1, 1], [], []>} : vector<8x8xf32>, vector<8x8xf32>, vector<8x8xf32> -> vector<8x8xf32>
    %c0_19 = arith.constant 0 : index
    %c0_20 = arith.constant 0 : index
    %52 = vector.load %arg4[%c0_19, %c0_20] : memref<1x8xf32, #tpu.memory_space<vmem>>, vector<1x8xf32>
    %53 = vector.broadcast %52 : vector<1x8xf32> to vector<8x8xf32>
    %54 = arith.addf %51, %53 : vector<8x8xf32>
    %c0_21 = arith.constant 0 : index
    %c0_22 = arith.constant 0 : index
    %55 = vector.load %arg5[%c0_21, %c0_22] : memref<8x10xf32, #tpu.memory_space<vmem>>, vector<8x10xf32>
    %cst_23 = arith.constant dense<0.000000e+00> : vector<8x10xf32>
    %56 = tpu.matmul %54, %55, %cst_23 {dimension_numbers = #tpu.dot_dimension_numbers<[1], [0], [0], [1], [0, 0, 1, 1], [], []>} : vector<8x8xf32>, vector<8x10xf32>, vector<8x10xf32> -> vector<8x10xf32>
    %c0_24 = arith.constant 0 : index
    %c0_25 = arith.constant 0 : index
    %57 = vector.load %arg6[%c0_24, %c0_25] : memref<1x10xf32, #tpu.memory_space<vmem>>, vector<1x10xf32>
    %58 = vector.broadcast %57 : vector<1x10xf32> to vector<8x10xf32>
    %59 = arith.addf %56, %58 : vector<8x10xf32>
    %60 = vector.extract_strided_slice %59 {offsets = [0, 0], sizes = [8, 8], strides = [1, 1]} : vector<8x10xf32> to vector<8x8xf32>
    %61 = vector.extract_strided_slice %59 {offsets = [0, 8], sizes = [8, 2], strides = [1, 1]} : vector<8x10xf32> to vector<8x2xf32>
    %62 = vector.extract_strided_slice %61 {offsets = [0, 0], sizes = [8, 1], strides = [1, 1]} : vector<8x2xf32> to vector<8x1xf32>
    %63 = vector.broadcast %62 : vector<8x1xf32> to vector<8x8xf32>
    %64 = arith.mulf %63, %60 : vector<8x8xf32>
    %65 = vector.extract_strided_slice %61 {offsets = [0, 1], sizes = [8, 1], strides = [1, 1]} : vector<8x2xf32> to vector<8x1xf32>
    %66 = vector.broadcast %65 : vector<8x1xf32> to vector<8x8xf32>
    %67 = arith.mulf %66, %60 : vector<8x8xf32>
    %68 = tpu.concatenate %64, %67 in 1 : vector<8x8xf32>, vector<8x8xf32> -> vector<8x16xf32>
    %c0_26 = arith.constant 0 : index
    %c0_27 = arith.constant 0 : index
    %69 = vector.load %arg2[%c0_26, %c0_27] : memref<8x16xf32, #tpu.memory_space<vmem>>, vector<8x16xf32>
    %70 = arith.addf %68, %69 : vector<8x16xf32>
    %c0_28 = arith.constant 0 : index
    %c0_29 = arith.constant 0 : index
    %71 = vector.load %arg10[%c0_28, %c0_29] : memref<8x16xf32, #tpu.memory_space<vmem>>, vector<8x16xf32>
    tpu.vector_store %arg10[%c0_28, %c0_29], %70 {strides = array<i32>} : memref<8x16xf32, #tpu.memory_space<vmem>>, vector<8x16xf32>,
    %cst_30 = arith.constant 5.000000e-01 : f32
    %72 = vector.broadcast %cst_30 : f32 to vector<8x16xf32>
    %73 = arith.mulf %72, %70 : vector<8x16xf32>
    %74 = math.cos %73 : vector<8x16xf32>
    %cst_31 = arith.constant 5.000000e-01 : f32
    %75 = vector.broadcast %cst_31 : f32 to vector<8x16xf32>
    %76 = arith.mulf %75, %70 : vector<8x16xf32>
    %77 = math.sin %76 : vector<8x16xf32>
    %cst_32 = arith.constant 5.000000e-01 : f32
    %78 = vector.broadcast %cst_32 : f32 to vector<8x8xf32>
    %79 = arith.mulf %78, %0 : vector<8x8xf32>
    %80 = math.cos %79 : vector<8x8xf32>
    %cst_33 = arith.constant 5.000000e-01 : f32
    %81 = vector.broadcast %cst_33 : f32 to vector<8x8xf32>
    %82 = arith.mulf %81, %0 : vector<8x8xf32>
    %83 = math.sin %82 : vector<8x8xf32>
    %cst_34 = arith.constant 6.250000e-02 : f32
    %84 = vector.broadcast %cst_34 : f32 to vector<8x256xf32>
    %85 = vector.extract_strided_slice %80 {offsets = [0, 0], sizes = [8, 1], strides = [1, 1]} : vector<8x8xf32> to vector<8x1xf32>
    %86 = vector.extract_strided_slice %83 {offsets = [0, 0], sizes = [8, 1], strides = [1, 1]} : vector<8x8xf32> to vector<8x1xf32>
    %87 = arith.subf %85, %86 : vector<8x1xf32>
    %88 = vector.extract_strided_slice %80 {offsets = [0, 0], sizes = [8, 1], strides = [1, 1]} : vector<8x8xf32> to vector<8x1xf32>
    %89 = vector.extract_strided_slice %83 {offsets = [0, 0], sizes = [8, 1], strides = [1, 1]} : vector<8x8xf32> to vector<8x1xf32>
    %90 = arith.addf %88, %89 : vector<8x1xf32>
    %91 = vector.shape_cast %7 : vector<1x256xi1> to vector<1x256xi1>
    %92 = vector.broadcast %91 : vector<1x256xi1> to vector<8x256xi1>
    %93 = vector.shape_cast %90 : vector<8x1xf32> to vector<8x1xf32>
    %94 = vector.broadcast %93 : vector<8x1xf32> to vector<8x256xf32>
    %95 = vector.shape_cast %87 : vector<8x1xf32> to vector<8x1xf32>
    %96 = vector.broadcast %95 : vector<8x1xf32> to vector<8x256xf32>
    %97 = arith.select %92, %94, %96 : vector<8x256xi1>, vector<8x256xf32>
    %98 = arith.mulf %84, %97 : vector<8x256xf32>
    %99 = vector.extract_strided_slice %80 {offsets = [0, 1], sizes = [8, 1], strides = [1, 1]} : vector<8x8xf32> to vector<8x1xf32>
    %100 = vector.extract_strided_slice %83 {offsets = [0, 1], sizes = [8, 1], strides = [1, 1]} : vector<8x8xf32> to vector<8x1xf32>
    %101 = arith.subf %99, %100 : vector<8x1xf32>
    %102 = vector.extract_strided_slice %80 {offsets = [0, 1], sizes = [8, 1], strides = [1, 1]} : vector<8x8xf32> to vector<8x1xf32>
    %103 = vector.extract_strided_slice %83 {offsets = [0, 1], sizes = [8, 1], strides = [1, 1]} : vector<8x8xf32> to vector<8x1xf32>
    %104 = arith.addf %102, %103 : vector<8x1xf32>
    %105 = vector.shape_cast %13 : vector<1x256xi1> to vector<1x256xi1>
    %106 = vector.broadcast %105 : vector<1x256xi1> to vector<8x256xi1>
    %107 = vector.shape_cast %104 : vector<8x1xf32> to vector<8x1xf32>
    %108 = vector.broadcast %107 : vector<8x1xf32> to vector<8x256xf32>
    %109 = vector.shape_cast %101 : vector<8x1xf32> to vector<8x1xf32>
    %110 = vector.broadcast %109 : vector<8x1xf32> to vector<8x256xf32>
    %111 = arith.select %106, %108, %110 : vector<8x256xi1>, vector<8x256xf32>
    %112 = arith.mulf %98, %111 : vector<8x256xf32>
    %113 = vector.extract_strided_slice %80 {offsets = [0, 2], sizes = [8, 1], strides = [1, 1]} : vector<8x8xf32> to vector<8x1xf32>
    %114 = vector.extract_strided_slice %83 {offsets = [0, 2], sizes = [8, 1], strides = [1, 1]} : vector<8x8xf32> to vector<8x1xf32>
    %115 = arith.subf %113, %114 : vector<8x1xf32>
    %116 = vector.extract_strided_slice %80 {offsets = [0, 2], sizes = [8, 1], strides = [1, 1]} : vector<8x8xf32> to vector<8x1xf32>
    %117 = vector.extract_strided_slice %83 {offsets = [0, 2], sizes = [8, 1], strides = [1, 1]} : vector<8x8xf32> to vector<8x1xf32>
    %118 = arith.addf %116, %117 : vector<8x1xf32>
    %119 = vector.shape_cast %19 : vector<1x256xi1> to vector<1x256xi1>
    %120 = vector.broadcast %119 : vector<1x256xi1> to vector<8x256xi1>
    %121 = vector.shape_cast %118 : vector<8x1xf32> to vector<8x1xf32>
    %122 = vector.broadcast %121 : vector<8x1xf32> to vector<8x256xf32>
    %123 = vector.shape_cast %115 : vector<8x1xf32> to vector<8x1xf32>
    %124 = vector.broadcast %123 : vector<8x1xf32> to vector<8x256xf32>
    %125 = arith.select %120, %122, %124 : vector<8x256xi1>, vector<8x256xf32>
    %126 = arith.mulf %112, %125 : vector<8x256xf32>
    %127 = vector.extract_strided_slice %80 {offsets = [0, 3], sizes = [8, 1], strides = [1, 1]} : vector<8x8xf32> to vector<8x1xf32>
    %128 = vector.extract_strided_slice %83 {offsets = [0, 3], sizes = [8, 1], strides = [1, 1]} : vector<8x8xf32> to vector<8x1xf32>
    %129 = arith.subf %127, %128 : vector<8x1xf32>
    %130 = vector.extract_strided_slice %80 {offsets = [0, 3], sizes = [8, 1], strides = [1, 1]} : vector<8x8xf32> to vector<8x1xf32>
    %131 = vector.extract_strided_slice %83 {offsets = [0, 3], sizes = [8, 1], strides = [1, 1]} : vector<8x8xf32> to vector<8x1xf32>
    %132 = arith.addf %130, %131 : vector<8x1xf32>
    %133 = vector.shape_cast %25 : vector<1x256xi1> to vector<1x256xi1>
    %134 = vector.broadcast %133 : vector<1x256xi1> to vector<8x256xi1>
    %135 = vector.shape_cast %132 : vector<8x1xf32> to vector<8x1xf32>
    %136 = vector.broadcast %135 : vector<8x1xf32> to vector<8x256xf32>
    %137 = vector.shape_cast %129 : vector<8x1xf32> to vector<8x1xf32>
    %138 = vector.broadcast %137 : vector<8x1xf32> to vector<8x256xf32>
    %139 = arith.select %134, %136, %138 : vector<8x256xi1>, vector<8x256xf32>
    %140 = arith.mulf %126, %139 : vector<8x256xf32>
    %141 = vector.extract_strided_slice %80 {offsets = [0, 4], sizes = [8, 1], strides = [1, 1]} : vector<8x8xf32> to vector<8x1xf32>
    %142 = vector.extract_strided_slice %83 {offsets = [0, 4], sizes = [8, 1], strides = [1, 1]} : vector<8x8xf32> to vector<8x1xf32>
    %143 = arith.subf %141, %142 : vector<8x1xf32>
    %144 = vector.extract_strided_slice %80 {offsets = [0, 4], sizes = [8, 1], strides = [1, 1]} : vector<8x8xf32> to vector<8x1xf32>
    %145 = vector.extract_strided_slice %83 {offsets = [0, 4], sizes = [8, 1], strides = [1, 1]} : vector<8x8xf32> to vector<8x1xf32>
    %146 = arith.addf %144, %145 : vector<8x1xf32>
    %147 = vector.shape_cast %31 : vector<1x256xi1> to vector<1x256xi1>
    %148 = vector.broadcast %147 : vector<1x256xi1> to vector<8x256xi1>
    %149 = vector.shape_cast %146 : vector<8x1xf32> to vector<8x1xf32>
    %150 = vector.broadcast %149 : vector<8x1xf32> to vector<8x256xf32>
    %151 = vector.shape_cast %143 : vector<8x1xf32> to vector<8x1xf32>
    %152 = vector.broadcast %151 : vector<8x1xf32> to vector<8x256xf32>
    %153 = arith.select %148, %150, %152 : vector<8x256xi1>, vector<8x256xf32>
    %154 = arith.mulf %140, %153 : vector<8x256xf32>
    %155 = vector.extract_strided_slice %80 {offsets = [0, 5], sizes = [8, 1], strides = [1, 1]} : vector<8x8xf32> to vector<8x1xf32>
    %156 = vector.extract_strided_slice %83 {offsets = [0, 5], sizes = [8, 1], strides = [1, 1]} : vector<8x8xf32> to vector<8x1xf32>
    %157 = arith.subf %155, %156 : vector<8x1xf32>
    %158 = vector.extract_strided_slice %80 {offsets = [0, 5], sizes = [8, 1], strides = [1, 1]} : vector<8x8xf32> to vector<8x1xf32>
    %159 = vector.extract_strided_slice %83 {offsets = [0, 5], sizes = [8, 1], strides = [1, 1]} : vector<8x8xf32> to vector<8x1xf32>
    %160 = arith.addf %158, %159 : vector<8x1xf32>
    %161 = vector.shape_cast %37 : vector<1x256xi1> to vector<1x256xi1>
    %162 = vector.broadcast %161 : vector<1x256xi1> to vector<8x256xi1>
    %163 = vector.shape_cast %160 : vector<8x1xf32> to vector<8x1xf32>
    %164 = vector.broadcast %163 : vector<8x1xf32> to vector<8x256xf32>
    %165 = vector.shape_cast %157 : vector<8x1xf32> to vector<8x1xf32>
    %166 = vector.broadcast %165 : vector<8x1xf32> to vector<8x256xf32>
    %167 = arith.select %162, %164, %166 : vector<8x256xi1>, vector<8x256xf32>
    %168 = arith.mulf %154, %167 : vector<8x256xf32>
    %169 = vector.extract_strided_slice %80 {offsets = [0, 6], sizes = [8, 1], strides = [1, 1]} : vector<8x8xf32> to vector<8x1xf32>
    %170 = vector.extract_strided_slice %83 {offsets = [0, 6], sizes = [8, 1], strides = [1, 1]} : vector<8x8xf32> to vector<8x1xf32>
    %171 = arith.subf %169, %170 : vector<8x1xf32>
    %172 = vector.extract_strided_slice %80 {offsets = [0, 6], sizes = [8, 1], strides = [1, 1]} : vector<8x8xf32> to vector<8x1xf32>
    %173 = vector.extract_strided_slice %83 {offsets = [0, 6], sizes = [8, 1], strides = [1, 1]} : vector<8x8xf32> to vector<8x1xf32>
    %174 = arith.addf %172, %173 : vector<8x1xf32>
    %175 = vector.shape_cast %43 : vector<1x256xi1> to vector<1x256xi1>
    %176 = vector.broadcast %175 : vector<1x256xi1> to vector<8x256xi1>
    %177 = vector.shape_cast %174 : vector<8x1xf32> to vector<8x1xf32>
    %178 = vector.broadcast %177 : vector<8x1xf32> to vector<8x256xf32>
    %179 = vector.shape_cast %171 : vector<8x1xf32> to vector<8x1xf32>
    %180 = vector.broadcast %179 : vector<8x1xf32> to vector<8x256xf32>
    %181 = arith.select %176, %178, %180 : vector<8x256xi1>, vector<8x256xf32>
    %182 = arith.mulf %168, %181 : vector<8x256xf32>
    %183 = vector.extract_strided_slice %80 {offsets = [0, 7], sizes = [8, 1], strides = [1, 1]} : vector<8x8xf32> to vector<8x1xf32>
    %184 = vector.extract_strided_slice %83 {offsets = [0, 7], sizes = [8, 1], strides = [1, 1]} : vector<8x8xf32> to vector<8x1xf32>
    %185 = arith.subf %183, %184 : vector<8x1xf32>
    %186 = vector.extract_strided_slice %80 {offsets = [0, 7], sizes = [8, 1], strides = [1, 1]} : vector<8x8xf32> to vector<8x1xf32>
    %187 = vector.extract_strided_slice %83 {offsets = [0, 7], sizes = [8, 1], strides = [1, 1]} : vector<8x8xf32> to vector<8x1xf32>
    %188 = arith.addf %186, %187 : vector<8x1xf32>
    %189 = vector.shape_cast %49 : vector<1x256xi1> to vector<1x256xi1>
    %190 = vector.broadcast %189 : vector<1x256xi1> to vector<8x256xi1>
    %191 = vector.shape_cast %188 : vector<8x1xf32> to vector<8x1xf32>
    %192 = vector.broadcast %191 : vector<8x1xf32> to vector<8x256xf32>
    %193 = vector.shape_cast %185 : vector<8x1xf32> to vector<8x1xf32>
    %194 = vector.broadcast %193 : vector<8x1xf32> to vector<8x256xf32>
    %195 = arith.select %190, %192, %194 : vector<8x256xi1>, vector<8x256xf32>
    %196 = arith.mulf %182, %195 : vector<8x256xf32>
    %c2_i32_35 = arith.constant 2 : i32
    %197 = tpu.dynamic_rotate %196 by %c2_i32_35 dim 1 : vector<8x256xf32>, i32 -> vector<8x256xf32>
    %c254_i32 = arith.constant 254 : i32
    %198 = tpu.dynamic_rotate %196 by %c254_i32 dim 1 : vector<8x256xf32>, i32 -> vector<8x256xf32>
    %199 = vector.shape_cast %13 : vector<1x256xi1> to vector<1x256xi1>
    %200 = vector.broadcast %199 : vector<1x256xi1> to vector<8x256xi1>
    %201 = arith.select %200, %197, %198 : vector<8x256xi1>, vector<8x256xf32>
    %202 = vector.shape_cast %7 : vector<1x256xi1> to vector<1x256xi1>
    %203 = vector.broadcast %202 : vector<1x256xi1> to vector<8x256xi1>
    %204 = arith.select %203, %201, %196 : vector<8x256xi1>, vector<8x256xf32>
    %c8_i32 = arith.constant 8 : i32
    %205 = tpu.dynamic_rotate %204 by %c8_i32 dim 1 : vector<8x256xf32>, i32 -> vector<8x256xf32>
    %c248_i32 = arith.constant 248 : i32
    %206 = tpu.dynamic_rotate %204 by %c248_i32 dim 1 : vector<8x256xf32>, i32 -> vector<8x256xf32>
    %207 = vector.shape_cast %25 : vector<1x256xi1> to vector<1x256xi1>
    %208 = vector.broadcast %207 : vector<1x256xi1> to vector<8x256xi1>
    %209 = arith.select %208, %205, %206 : vector<8x256xi1>, vector<8x256xf32>
    %210 = vector.shape_cast %19 : vector<1x256xi1> to vector<1x256xi1>
    %211 = vector.broadcast %210 : vector<1x256xi1> to vector<8x256xi1>
    %212 = arith.select %211, %209, %204 : vector<8x256xi1>, vector<8x256xf32>
    %c32_i32 = arith.constant 32 : i32
    %213 = tpu.dynamic_rotate %212 by %c32_i32 dim 1 : vector<8x256xf32>, i32 -> vector<8x256xf32>
    %c224_i32 = arith.constant 224 : i32
    %214 = tpu.dynamic_rotate %212 by %c224_i32 dim 1 : vector<8x256xf32>, i32 -> vector<8x256xf32>
    %215 = vector.shape_cast %37 : vector<1x256xi1> to vector<1x256xi1>
    %216 = vector.broadcast %215 : vector<1x256xi1> to vector<8x256xi1>
    %217 = arith.select %216, %213, %214 : vector<8x256xi1>, vector<8x256xf32>
    %218 = vector.shape_cast %31 : vector<1x256xi1> to vector<1x256xi1>
    %219 = vector.broadcast %218 : vector<1x256xi1> to vector<8x256xi1>
    %220 = arith.select %219, %217, %212 : vector<8x256xi1>, vector<8x256xf32>
    %c128_i32 = arith.constant 128 : i32
    %221 = tpu.dynamic_rotate %220 by %c128_i32 dim 1 : vector<8x256xf32>, i32 -> vector<8x256xf32>
    %c128_i32_36 = arith.constant 128 : i32
    %222 = tpu.dynamic_rotate %220 by %c128_i32_36 dim 1 : vector<8x256xf32>, i32 -> vector<8x256xf32>
    %223 = vector.shape_cast %49 : vector<1x256xi1> to vector<1x256xi1>
    %224 = vector.broadcast %223 : vector<1x256xi1> to vector<8x256xi1>
    %225 = arith.select %224, %221, %222 : vector<8x256xi1>, vector<8x256xf32>
    %226 = vector.shape_cast %43 : vector<1x256xi1> to vector<1x256xi1>
    %227 = vector.broadcast %226 : vector<1x256xi1> to vector<8x256xi1>
    %228 = arith.select %227, %225, %220 : vector<8x256xi1>, vector<8x256xf32>
    %c4_i32_37 = arith.constant 4 : i32
    %229 = tpu.dynamic_rotate %228 by %c4_i32_37 dim 1 : vector<8x256xf32>, i32 -> vector<8x256xf32>
    %c252_i32 = arith.constant 252 : i32
    %230 = tpu.dynamic_rotate %228 by %c252_i32 dim 1 : vector<8x256xf32>, i32 -> vector<8x256xf32>
    %231 = vector.shape_cast %19 : vector<1x256xi1> to vector<1x256xi1>
    %232 = vector.broadcast %231 : vector<1x256xi1> to vector<8x256xi1>
    %233 = arith.select %232, %229, %230 : vector<8x256xi1>, vector<8x256xf32>
    %234 = vector.shape_cast %13 : vector<1x256xi1> to vector<1x256xi1>
    %235 = vector.broadcast %234 : vector<1x256xi1> to vector<8x256xi1>
    %236 = arith.select %235, %233, %228 : vector<8x256xi1>, vector<8x256xf32>
    %c16_i32 = arith.constant 16 : i32
    %237 = tpu.dynamic_rotate %236 by %c16_i32 dim 1 : vector<8x256xf32>, i32 -> vector<8x256xf32>
    %c240_i32 = arith.constant 240 : i32
    %238 = tpu.dynamic_rotate %236 by %c240_i32 dim 1 : vector<8x256xf32>, i32 -> vector<8x256xf32>
    %239 = vector.shape_cast %31 : vector<1x256xi1> to vector<1x256xi1>
    %240 = vector.broadcast %239 : vector<1x256xi1> to vector<8x256xi1>
    %241 = arith.select %240, %237, %238 : vector<8x256xi1>, vector<8x256xf32>
    %242 = vector.shape_cast %25 : vector<1x256xi1> to vector<1x256xi1>
    %243 = vector.broadcast %242 : vector<1x256xi1> to vector<8x256xi1>
    %244 = arith.select %243, %241, %236 : vector<8x256xi1>, vector<8x256xf32>
    %c64_i32 = arith.constant 64 : i32
    %245 = tpu.dynamic_rotate %244 by %c64_i32 dim 1 : vector<8x256xf32>, i32 -> vector<8x256xf32>
    %c192_i32 = arith.constant 192 : i32
    %246 = tpu.dynamic_rotate %244 by %c192_i32 dim 1 : vector<8x256xf32>, i32 -> vector<8x256xf32>
    %247 = vector.shape_cast %43 : vector<1x256xi1> to vector<1x256xi1>
    %248 = vector.broadcast %247 : vector<1x256xi1> to vector<8x256xi1>
    %249 = arith.select %248, %245, %246 : vector<8x256xi1>, vector<8x256xf32>
    %250 = vector.shape_cast %37 : vector<1x256xi1> to vector<1x256xi1>
    %251 = vector.broadcast %250 : vector<1x256xi1> to vector<8x256xi1>
    %252 = arith.select %251, %249, %244 : vector<8x256xi1>, vector<8x256xf32>
    %253 = vector.extract_strided_slice %74 {offsets = [0, 0], sizes = [8, 8], strides = [1, 1]} : vector<8x16xf32> to vector<8x8xf32>
    %254 = vector.extract_strided_slice %77 {offsets = [0, 0], sizes = [8, 8], strides = [1, 1]} : vector<8x16xf32> to vector<8x8xf32>
    %c1_i32_38 = arith.constant 1 : i32
    %255 = tpu.dynamic_rotate %252 by %c1_i32_38 dim 1 : vector<8x256xf32>, i32 -> vector<8x256xf32>
    %c255_i32 = arith.constant 255 : i32
    %256 = tpu.dynamic_rotate %252 by %c255_i32 dim 1 : vector<8x256xf32>, i32 -> vector<8x256xf32>
    %cst_39 = arith.constant 0.000000e+00 : f32
    %257 = vector.broadcast %cst_39 : f32 to vector<8x256xf32>
    %258 = arith.subf %257, %256 : vector<8x256xf32>
    %259 = vector.shape_cast %7 : vector<1x256xi1> to vector<1x256xi1>
    %260 = vector.broadcast %259 : vector<1x256xi1> to vector<8x256xi1>
    %261 = arith.select %260, %255, %258 : vector<8x256xi1>, vector<8x256xf32>
    %262 = vector.extract_strided_slice %253 {offsets = [0, 0], sizes = [8, 1], strides = [1, 1]} : vector<8x8xf32> to vector<8x1xf32>
    %263 = vector.broadcast %262 : vector<8x1xf32> to vector<8x256xf32>
    %264 = arith.mulf %263, %252 : vector<8x256xf32>
    %265 = vector.extract_strided_slice %254 {offsets = [0, 0], sizes = [8, 1], strides = [1, 1]} : vector<8x8xf32> to vector<8x1xf32>
    %266 = vector.broadcast %265 : vector<8x1xf32> to vector<8x256xf32>
    %267 = arith.mulf %266, %261 : vector<8x256xf32>
    %268 = arith.addf %264, %267 : vector<8x256xf32>
    %c2_i32_40 = arith.constant 2 : i32
    %269 = tpu.dynamic_rotate %268 by %c2_i32_40 dim 1 : vector<8x256xf32>, i32 -> vector<8x256xf32>
    %c254_i32_41 = arith.constant 254 : i32
    %270 = tpu.dynamic_rotate %268 by %c254_i32_41 dim 1 : vector<8x256xf32>, i32 -> vector<8x256xf32>
    %cst_42 = arith.constant 0.000000e+00 : f32
    %271 = vector.broadcast %cst_42 : f32 to vector<8x256xf32>
    %272 = arith.subf %271, %270 : vector<8x256xf32>
    %273 = vector.shape_cast %13 : vector<1x256xi1> to vector<1x256xi1>
    %274 = vector.broadcast %273 : vector<1x256xi1> to vector<8x256xi1>
    %275 = arith.select %274, %269, %272 : vector<8x256xi1>, vector<8x256xf32>
    %276 = vector.extract_strided_slice %253 {offsets = [0, 1], sizes = [8, 1], strides = [1, 1]} : vector<8x8xf32> to vector<8x1xf32>
    %277 = vector.broadcast %276 : vector<8x1xf32> to vector<8x256xf32>
    %278 = arith.mulf %277, %268 : vector<8x256xf32>
    %279 = vector.extract_strided_slice %254 {offsets = [0, 1], sizes = [8, 1], strides = [1, 1]} : vector<8x8xf32> to vector<8x1xf32>
    %280 = vector.broadcast %279 : vector<8x1xf32> to vector<8x256xf32>
    %281 = arith.mulf %280, %275 : vector<8x256xf32>
    %282 = arith.addf %278, %281 : vector<8x256xf32>
    %c4_i32_43 = arith.constant 4 : i32
    %283 = tpu.dynamic_rotate %282 by %c4_i32_43 dim 1 : vector<8x256xf32>, i32 -> vector<8x256xf32>
    %c252_i32_44 = arith.constant 252 : i32
    %284 = tpu.dynamic_rotate %282 by %c252_i32_44 dim 1 : vector<8x256xf32>, i32 -> vector<8x256xf32>
    %cst_45 = arith.constant 0.000000e+00 : f32
    %285 = vector.broadcast %cst_45 : f32 to vector<8x256xf32>
    %286 = arith.subf %285, %284 : vector<8x256xf32>
    %287 = vector.shape_cast %19 : vector<1x256xi1> to vector<1x256xi1>
    %288 = vector.broadcast %287 : vector<1x256xi1> to vector<8x256xi1>
    %289 = arith.select %288, %283, %286 : vector<8x256xi1>, vector<8x256xf32>
    %290 = vector.extract_strided_slice %253 {offsets = [0, 2], sizes = [8, 1], strides = [1, 1]} : vector<8x8xf32> to vector<8x1xf32>
    %291 = vector.broadcast %290 : vector<8x1xf32> to vector<8x256xf32>
    %292 = arith.mulf %291, %282 : vector<8x256xf32>
    %293 = vector.extract_strided_slice %254 {offsets = [0, 2], sizes = [8, 1], strides = [1, 1]} : vector<8x8xf32> to vector<8x1xf32>
    %294 = vector.broadcast %293 : vector<8x1xf32> to vector<8x256xf32>
    %295 = arith.mulf %294, %289 : vector<8x256xf32>
    %296 = arith.addf %292, %295 : vector<8x256xf32>
    %c8_i32_46 = arith.constant 8 : i32
    %297 = tpu.dynamic_rotate %296 by %c8_i32_46 dim 1 : vector<8x256xf32>, i32 -> vector<8x256xf32>
    %c248_i32_47 = arith.constant 248 : i32
    %298 = tpu.dynamic_rotate %296 by %c248_i32_47 dim 1 : vector<8x256xf32>, i32 -> vector<8x256xf32>
    %cst_48 = arith.constant 0.000000e+00 : f32
    %299 = vector.broadcast %cst_48 : f32 to vector<8x256xf32>
    %300 = arith.subf %299, %298 : vector<8x256xf32>
    %301 = vector.shape_cast %25 : vector<1x256xi1> to vector<1x256xi1>
    %302 = vector.broadcast %301 : vector<1x256xi1> to vector<8x256xi1>
    %303 = arith.select %302, %297, %300 : vector<8x256xi1>, vector<8x256xf32>
    %304 = vector.extract_strided_slice %253 {offsets = [0, 3], sizes = [8, 1], strides = [1, 1]} : vector<8x8xf32> to vector<8x1xf32>
    %305 = vector.broadcast %304 : vector<8x1xf32> to vector<8x256xf32>
    %306 = arith.mulf %305, %296 : vector<8x256xf32>
    %307 = vector.extract_strided_slice %254 {offsets = [0, 3], sizes = [8, 1], strides = [1, 1]} : vector<8x8xf32> to vector<8x1xf32>
    %308 = vector.broadcast %307 : vector<8x1xf32> to vector<8x256xf32>
    %309 = arith.mulf %308, %303 : vector<8x256xf32>
    %310 = arith.addf %306, %309 : vector<8x256xf32>
    %c16_i32_49 = arith.constant 16 : i32
    %311 = tpu.dynamic_rotate %310 by %c16_i32_49 dim 1 : vector<8x256xf32>, i32 -> vector<8x256xf32>
    %c240_i32_50 = arith.constant 240 : i32
    %312 = tpu.dynamic_rotate %310 by %c240_i32_50 dim 1 : vector<8x256xf32>, i32 -> vector<8x256xf32>
    %cst_51 = arith.constant 0.000000e+00 : f32
    %313 = vector.broadcast %cst_51 : f32 to vector<8x256xf32>
    %314 = arith.subf %313, %312 : vector<8x256xf32>
    %315 = vector.shape_cast %31 : vector<1x256xi1> to vector<1x256xi1>
    %316 = vector.broadcast %315 : vector<1x256xi1> to vector<8x256xi1>
    %317 = arith.select %316, %311, %314 : vector<8x256xi1>, vector<8x256xf32>
    %318 = vector.extract_strided_slice %253 {offsets = [0, 4], sizes = [8, 1], strides = [1, 1]} : vector<8x8xf32> to vector<8x1xf32>
    %319 = vector.broadcast %318 : vector<8x1xf32> to vector<8x256xf32>
    %320 = arith.mulf %319, %310 : vector<8x256xf32>
    %321 = vector.extract_strided_slice %254 {offsets = [0, 4], sizes = [8, 1], strides = [1, 1]} : vector<8x8xf32> to vector<8x1xf32>
    %322 = vector.broadcast %321 : vector<8x1xf32> to vector<8x256xf32>
    %323 = arith.mulf %322, %317 : vector<8x256xf32>
    %324 = arith.addf %320, %323 : vector<8x256xf32>
    %c32_i32_52 = arith.constant 32 : i32
    %325 = tpu.dynamic_rotate %324 by %c32_i32_52 dim 1 : vector<8x256xf32>, i32 -> vector<8x256xf32>
    %c224_i32_53 = arith.constant 224 : i32
    %326 = tpu.dynamic_rotate %324 by %c224_i32_53 dim 1 : vector<8x256xf32>, i32 -> vector<8x256xf32>
    %cst_54 = arith.constant 0.000000e+00 : f32
    %327 = vector.broadcast %cst_54 : f32 to vector<8x256xf32>
    %328 = arith.subf %327, %326 : vector<8x256xf32>
    %329 = vector.shape_cast %37 : vector<1x256xi1> to vector<1x256xi1>
    %330 = vector.broadcast %329 : vector<1x256xi1> to vector<8x256xi1>
    %331 = arith.select %330, %325, %328 : vector<8x256xi1>, vector<8x256xf32>
    %332 = vector.extract_strided_slice %253 {offsets = [0, 5], sizes = [8, 1], strides = [1, 1]} : vector<8x8xf32> to vector<8x1xf32>
    %333 = vector.broadcast %332 : vector<8x1xf32> to vector<8x256xf32>
    %334 = arith.mulf %333, %324 : vector<8x256xf32>
    %335 = vector.extract_strided_slice %254 {offsets = [0, 5], sizes = [8, 1], strides = [1, 1]} : vector<8x8xf32> to vector<8x1xf32>
    %336 = vector.broadcast %335 : vector<8x1xf32> to vector<8x256xf32>
    %337 = arith.mulf %336, %331 : vector<8x256xf32>
    %338 = arith.addf %334, %337 : vector<8x256xf32>
    %c64_i32_55 = arith.constant 64 : i32
    %339 = tpu.dynamic_rotate %338 by %c64_i32_55 dim 1 : vector<8x256xf32>, i32 -> vector<8x256xf32>
    %c192_i32_56 = arith.constant 192 : i32
    %340 = tpu.dynamic_rotate %338 by %c192_i32_56 dim 1 : vector<8x256xf32>, i32 -> vector<8x256xf32>
    %cst_57 = arith.constant 0.000000e+00 : f32
    %341 = vector.broadcast %cst_57 : f32 to vector<8x256xf32>
    %342 = arith.subf %341, %340 : vector<8x256xf32>
    %343 = vector.shape_cast %43 : vector<1x256xi1> to vector<1x256xi1>
    %344 = vector.broadcast %343 : vector<1x256xi1> to vector<8x256xi1>
    %345 = arith.select %344, %339, %342 : vector<8x256xi1>, vector<8x256xf32>
    %346 = vector.extract_strided_slice %253 {offsets = [0, 6], sizes = [8, 1], strides = [1, 1]} : vector<8x8xf32> to vector<8x1xf32>
    %347 = vector.broadcast %346 : vector<8x1xf32> to vector<8x256xf32>
    %348 = arith.mulf %347, %338 : vector<8x256xf32>
    %349 = vector.extract_strided_slice %254 {offsets = [0, 6], sizes = [8, 1], strides = [1, 1]} : vector<8x8xf32> to vector<8x1xf32>
    %350 = vector.broadcast %349 : vector<8x1xf32> to vector<8x256xf32>
    %351 = arith.mulf %350, %345 : vector<8x256xf32>
    %352 = arith.addf %348, %351 : vector<8x256xf32>
    %c128_i32_58 = arith.constant 128 : i32
    %353 = tpu.dynamic_rotate %352 by %c128_i32_58 dim 1 : vector<8x256xf32>, i32 -> vector<8x256xf32>
    %c128_i32_59 = arith.constant 128 : i32
    %354 = tpu.dynamic_rotate %352 by %c128_i32_59 dim 1 : vector<8x256xf32>, i32 -> vector<8x256xf32>
    %cst_60 = arith.constant 0.000000e+00 : f32
    %355 = vector.broadcast %cst_60 : f32 to vector<8x256xf32>
    %356 = arith.subf %355, %354 : vector<8x256xf32>
    %357 = vector.shape_cast %49 : vector<1x256xi1> to vector<1x256xi1>
    %358 = vector.broadcast %357 : vector<1x256xi1> to vector<8x256xi1>
    %359 = arith.select %358, %353, %356 : vector<8x256xi1>, vector<8x256xf32>
    %360 = vector.extract_strided_slice %253 {offsets = [0, 7], sizes = [8, 1], strides = [1, 1]} : vector<8x8xf32> to vector<8x1xf32>
    %361 = vector.broadcast %360 : vector<8x1xf32> to vector<8x256xf32>
    %362 = arith.mulf %361, %352 : vector<8x256xf32>
    %363 = vector.extract_strided_slice %254 {offsets = [0, 7], sizes = [8, 1], strides = [1, 1]} : vector<8x8xf32> to vector<8x1xf32>
    %364 = vector.broadcast %363 : vector<8x1xf32> to vector<8x256xf32>
    %365 = arith.mulf %364, %359 : vector<8x256xf32>
    %366 = arith.addf %362, %365 : vector<8x256xf32>
    %c2_i32_61 = arith.constant 2 : i32
    %367 = tpu.dynamic_rotate %366 by %c2_i32_61 dim 1 : vector<8x256xf32>, i32 -> vector<8x256xf32>
    %c254_i32_62 = arith.constant 254 : i32
    %368 = tpu.dynamic_rotate %366 by %c254_i32_62 dim 1 : vector<8x256xf32>, i32 -> vector<8x256xf32>
    %369 = vector.shape_cast %13 : vector<1x256xi1> to vector<1x256xi1>
    %370 = vector.broadcast %369 : vector<1x256xi1> to vector<8x256xi1>
    %371 = arith.select %370, %367, %368 : vector<8x256xi1>, vector<8x256xf32>
    %372 = vector.shape_cast %7 : vector<1x256xi1> to vector<1x256xi1>
    %373 = vector.broadcast %372 : vector<1x256xi1> to vector<8x256xi1>
    %374 = arith.select %373, %371, %366 : vector<8x256xi1>, vector<8x256xf32>
    %c8_i32_63 = arith.constant 8 : i32
    %375 = tpu.dynamic_rotate %374 by %c8_i32_63 dim 1 : vector<8x256xf32>, i32 -> vector<8x256xf32>
    %c248_i32_64 = arith.constant 248 : i32
    %376 = tpu.dynamic_rotate %374 by %c248_i32_64 dim 1 : vector<8x256xf32>, i32 -> vector<8x256xf32>
    %377 = vector.shape_cast %25 : vector<1x256xi1> to vector<1x256xi1>
    %378 = vector.broadcast %377 : vector<1x256xi1> to vector<8x256xi1>
    %379 = arith.select %378, %375, %376 : vector<8x256xi1>, vector<8x256xf32>
    %380 = vector.shape_cast %19 : vector<1x256xi1> to vector<1x256xi1>
    %381 = vector.broadcast %380 : vector<1x256xi1> to vector<8x256xi1>
    %382 = arith.select %381, %379, %374 : vector<8x256xi1>, vector<8x256xf32>
    %c32_i32_65 = arith.constant 32 : i32
    %383 = tpu.dynamic_rotate %382 by %c32_i32_65 dim 1 : vector<8x256xf32>, i32 -> vector<8x256xf32>
    %c224_i32_66 = arith.constant 224 : i32
    %384 = tpu.dynamic_rotate %382 by %c224_i32_66 dim 1 : vector<8x256xf32>, i32 -> vector<8x256xf32>
    %385 = vector.shape_cast %37 : vector<1x256xi1> to vector<1x256xi1>
    %386 = vector.broadcast %385 : vector<1x256xi1> to vector<8x256xi1>
    %387 = arith.select %386, %383, %384 : vector<8x256xi1>, vector<8x256xf32>
    %388 = vector.shape_cast %31 : vector<1x256xi1> to vector<1x256xi1>
    %389 = vector.broadcast %388 : vector<1x256xi1> to vector<8x256xi1>
    %390 = arith.select %389, %387, %382 : vector<8x256xi1>, vector<8x256xf32>
    %c128_i32_67 = arith.constant 128 : i32
    %391 = tpu.dynamic_rotate %390 by %c128_i32_67 dim 1 : vector<8x256xf32>, i32 -> vector<8x256xf32>
    %c128_i32_68 = arith.constant 128 : i32
    %392 = tpu.dynamic_rotate %390 by %c128_i32_68 dim 1 : vector<8x256xf32>, i32 -> vector<8x256xf32>
    %393 = vector.shape_cast %49 : vector<1x256xi1> to vector<1x256xi1>
    %394 = vector.broadcast %393 : vector<1x256xi1> to vector<8x256xi1>
    %395 = arith.select %394, %391, %392 : vector<8x256xi1>, vector<8x256xf32>
    %396 = vector.shape_cast %43 : vector<1x256xi1> to vector<1x256xi1>
    %397 = vector.broadcast %396 : vector<1x256xi1> to vector<8x256xi1>
    %398 = arith.select %397, %395, %390 : vector<8x256xi1>, vector<8x256xf32>
    %c4_i32_69 = arith.constant 4 : i32
    %399 = tpu.dynamic_rotate %398 by %c4_i32_69 dim 1 : vector<8x256xf32>, i32 -> vector<8x256xf32>
    %c252_i32_70 = arith.constant 252 : i32
    %400 = tpu.dynamic_rotate %398 by %c252_i32_70 dim 1 : vector<8x256xf32>, i32 -> vector<8x256xf32>
    %401 = vector.shape_cast %19 : vector<1x256xi1> to vector<1x256xi1>
    %402 = vector.broadcast %401 : vector<1x256xi1> to vector<8x256xi1>
    %403 = arith.select %402, %399, %400 : vector<8x256xi1>, vector<8x256xf32>
    %404 = vector.shape_cast %13 : vector<1x256xi1> to vector<1x256xi1>
    %405 = vector.broadcast %404 : vector<1x256xi1> to vector<8x256xi1>
    %406 = arith.select %405, %403, %398 : vector<8x256xi1>, vector<8x256xf32>
    %c16_i32_71 = arith.constant 16 : i32
    %407 = tpu.dynamic_rotate %406 by %c16_i32_71 dim 1 : vector<8x256xf32>, i32 -> vector<8x256xf32>
    %c240_i32_72 = arith.constant 240 : i32
    %408 = tpu.dynamic_rotate %406 by %c240_i32_72 dim 1 : vector<8x256xf32>, i32 -> vector<8x256xf32>
    %409 = vector.shape_cast %31 : vector<1x256xi1> to vector<1x256xi1>
    %410 = vector.broadcast %409 : vector<1x256xi1> to vector<8x256xi1>
    %411 = arith.select %410, %407, %408 : vector<8x256xi1>, vector<8x256xf32>
    %412 = vector.shape_cast %25 : vector<1x256xi1> to vector<1x256xi1>
    %413 = vector.broadcast %412 : vector<1x256xi1> to vector<8x256xi1>
    %414 = arith.select %413, %411, %406 : vector<8x256xi1>, vector<8x256xf32>
    %c64_i32_73 = arith.constant 64 : i32
    %415 = tpu.dynamic_rotate %414 by %c64_i32_73 dim 1 : vector<8x256xf32>, i32 -> vector<8x256xf32>
    %c192_i32_74 = arith.constant 192 : i32
    %416 = tpu.dynamic_rotate %414 by %c192_i32_74 dim 1 : vector<8x256xf32>, i32 -> vector<8x256xf32>
    %417 = vector.shape_cast %43 : vector<1x256xi1> to vector<1x256xi1>
    %418 = vector.broadcast %417 : vector<1x256xi1> to vector<8x256xi1>
    %419 = arith.select %418, %415, %416 : vector<8x256xi1>, vector<8x256xf32>
    %420 = vector.shape_cast %37 : vector<1x256xi1> to vector<1x256xi1>
    %421 = vector.broadcast %420 : vector<1x256xi1> to vector<8x256xi1>
    %422 = arith.select %421, %419, %414 : vector<8x256xi1>, vector<8x256xf32>
    %423 = vector.extract_strided_slice %74 {offsets = [0, 8], sizes = [8, 8], strides = [1, 1]} : vector<8x16xf32> to vector<8x8xf32>
    %424 = vector.extract_strided_slice %77 {offsets = [0, 8], sizes = [8, 8], strides = [1, 1]} : vector<8x16xf32> to vector<8x8xf32>
    %c1_i32_75 = arith.constant 1 : i32
    %425 = tpu.dynamic_rotate %422 by %c1_i32_75 dim 1 : vector<8x256xf32>, i32 -> vector<8x256xf32>
    %c255_i32_76 = arith.constant 255 : i32
    %426 = tpu.dynamic_rotate %422 by %c255_i32_76 dim 1 : vector<8x256xf32>, i32 -> vector<8x256xf32>
    %cst_77 = arith.constant 0.000000e+00 : f32
    %427 = vector.broadcast %cst_77 : f32 to vector<8x256xf32>
    %428 = arith.subf %427, %426 : vector<8x256xf32>
    %429 = vector.shape_cast %7 : vector<1x256xi1> to vector<1x256xi1>
    %430 = vector.broadcast %429 : vector<1x256xi1> to vector<8x256xi1>
    %431 = arith.select %430, %425, %428 : vector<8x256xi1>, vector<8x256xf32>
    %432 = vector.extract_strided_slice %423 {offsets = [0, 0], sizes = [8, 1], strides = [1, 1]} : vector<8x8xf32> to vector<8x1xf32>
    %433 = vector.broadcast %432 : vector<8x1xf32> to vector<8x256xf32>
    %434 = arith.mulf %433, %422 : vector<8x256xf32>
    %435 = vector.extract_strided_slice %424 {offsets = [0, 0], sizes = [8, 1], strides = [1, 1]} : vector<8x8xf32> to vector<8x1xf32>
    %436 = vector.broadcast %435 : vector<8x1xf32> to vector<8x256xf32>
    %437 = arith.mulf %436, %431 : vector<8x256xf32>
    %438 = arith.addf %434, %437 : vector<8x256xf32>
    %c2_i32_78 = arith.constant 2 : i32
    %439 = tpu.dynamic_rotate %438 by %c2_i32_78 dim 1 : vector<8x256xf32>, i32 -> vector<8x256xf32>
    %c254_i32_79 = arith.constant 254 : i32
    %440 = tpu.dynamic_rotate %438 by %c254_i32_79 dim 1 : vector<8x256xf32>, i32 -> vector<8x256xf32>
    %cst_80 = arith.constant 0.000000e+00 : f32
    %441 = vector.broadcast %cst_80 : f32 to vector<8x256xf32>
    %442 = arith.subf %441, %440 : vector<8x256xf32>
    %443 = vector.shape_cast %13 : vector<1x256xi1> to vector<1x256xi1>
    %444 = vector.broadcast %443 : vector<1x256xi1> to vector<8x256xi1>
    %445 = arith.select %444, %439, %442 : vector<8x256xi1>, vector<8x256xf32>
    %446 = vector.extract_strided_slice %423 {offsets = [0, 1], sizes = [8, 1], strides = [1, 1]} : vector<8x8xf32> to vector<8x1xf32>
    %447 = vector.broadcast %446 : vector<8x1xf32> to vector<8x256xf32>
    %448 = arith.mulf %447, %438 : vector<8x256xf32>
    %449 = vector.extract_strided_slice %424 {offsets = [0, 1], sizes = [8, 1], strides = [1, 1]} : vector<8x8xf32> to vector<8x1xf32>
    %450 = vector.broadcast %449 : vector<8x1xf32> to vector<8x256xf32>
    %451 = arith.mulf %450, %445 : vector<8x256xf32>
    %452 = arith.addf %448, %451 : vector<8x256xf32>
    %c4_i32_81 = arith.constant 4 : i32
    %453 = tpu.dynamic_rotate %452 by %c4_i32_81 dim 1 : vector<8x256xf32>, i32 -> vector<8x256xf32>
    %c252_i32_82 = arith.constant 252 : i32
    %454 = tpu.dynamic_rotate %452 by %c252_i32_82 dim 1 : vector<8x256xf32>, i32 -> vector<8x256xf32>
    %cst_83 = arith.constant 0.000000e+00 : f32
    %455 = vector.broadcast %cst_83 : f32 to vector<8x256xf32>
    %456 = arith.subf %455, %454 : vector<8x256xf32>
    %457 = vector.shape_cast %19 : vector<1x256xi1> to vector<1x256xi1>
    %458 = vector.broadcast %457 : vector<1x256xi1> to vector<8x256xi1>
    %459 = arith.select %458, %453, %456 : vector<8x256xi1>, vector<8x256xf32>
    %460 = vector.extract_strided_slice %423 {offsets = [0, 2], sizes = [8, 1], strides = [1, 1]} : vector<8x8xf32> to vector<8x1xf32>
    %461 = vector.broadcast %460 : vector<8x1xf32> to vector<8x256xf32>
    %462 = arith.mulf %461, %452 : vector<8x256xf32>
    %463 = vector.extract_strided_slice %424 {offsets = [0, 2], sizes = [8, 1], strides = [1, 1]} : vector<8x8xf32> to vector<8x1xf32>
    %464 = vector.broadcast %463 : vector<8x1xf32> to vector<8x256xf32>
    %465 = arith.mulf %464, %459 : vector<8x256xf32>
    %466 = arith.addf %462, %465 : vector<8x256xf32>
    %c8_i32_84 = arith.constant 8 : i32
    %467 = tpu.dynamic_rotate %466 by %c8_i32_84 dim 1 : vector<8x256xf32>, i32 -> vector<8x256xf32>
    %c248_i32_85 = arith.constant 248 : i32
    %468 = tpu.dynamic_rotate %466 by %c248_i32_85 dim 1 : vector<8x256xf32>, i32 -> vector<8x256xf32>
    %cst_86 = arith.constant 0.000000e+00 : f32
    %469 = vector.broadcast %cst_86 : f32 to vector<8x256xf32>
    %470 = arith.subf %469, %468 : vector<8x256xf32>
    %471 = vector.shape_cast %25 : vector<1x256xi1> to vector<1x256xi1>
    %472 = vector.broadcast %471 : vector<1x256xi1> to vector<8x256xi1>
    %473 = arith.select %472, %467, %470 : vector<8x256xi1>, vector<8x256xf32>
    %474 = vector.extract_strided_slice %423 {offsets = [0, 3], sizes = [8, 1], strides = [1, 1]} : vector<8x8xf32> to vector<8x1xf32>
    %475 = vector.broadcast %474 : vector<8x1xf32> to vector<8x256xf32>
    %476 = arith.mulf %475, %466 : vector<8x256xf32>
    %477 = vector.extract_strided_slice %424 {offsets = [0, 3], sizes = [8, 1], strides = [1, 1]} : vector<8x8xf32> to vector<8x1xf32>
    %478 = vector.broadcast %477 : vector<8x1xf32> to vector<8x256xf32>
    %479 = arith.mulf %478, %473 : vector<8x256xf32>
    %480 = arith.addf %476, %479 : vector<8x256xf32>
    %c16_i32_87 = arith.constant 16 : i32
    %481 = tpu.dynamic_rotate %480 by %c16_i32_87 dim 1 : vector<8x256xf32>, i32 -> vector<8x256xf32>
    %c240_i32_88 = arith.constant 240 : i32
    %482 = tpu.dynamic_rotate %480 by %c240_i32_88 dim 1 : vector<8x256xf32>, i32 -> vector<8x256xf32>
    %cst_89 = arith.constant 0.000000e+00 : f32
    %483 = vector.broadcast %cst_89 : f32 to vector<8x256xf32>
    %484 = arith.subf %483, %482 : vector<8x256xf32>
    %485 = vector.shape_cast %31 : vector<1x256xi1> to vector<1x256xi1>
    %486 = vector.broadcast %485 : vector<1x256xi1> to vector<8x256xi1>
    %487 = arith.select %486, %481, %484 : vector<8x256xi1>, vector<8x256xf32>
    %488 = vector.extract_strided_slice %423 {offsets = [0, 4], sizes = [8, 1], strides = [1, 1]} : vector<8x8xf32> to vector<8x1xf32>
    %489 = vector.broadcast %488 : vector<8x1xf32> to vector<8x256xf32>
    %490 = arith.mulf %489, %480 : vector<8x256xf32>
    %491 = vector.extract_strided_slice %424 {offsets = [0, 4], sizes = [8, 1], strides = [1, 1]} : vector<8x8xf32> to vector<8x1xf32>
    %492 = vector.broadcast %491 : vector<8x1xf32> to vector<8x256xf32>
    %493 = arith.mulf %492, %487 : vector<8x256xf32>
    %494 = arith.addf %490, %493 : vector<8x256xf32>
    %c32_i32_90 = arith.constant 32 : i32
    %495 = tpu.dynamic_rotate %494 by %c32_i32_90 dim 1 : vector<8x256xf32>, i32 -> vector<8x256xf32>
    %c224_i32_91 = arith.constant 224 : i32
    %496 = tpu.dynamic_rotate %494 by %c224_i32_91 dim 1 : vector<8x256xf32>, i32 -> vector<8x256xf32>
    %cst_92 = arith.constant 0.000000e+00 : f32
    %497 = vector.broadcast %cst_92 : f32 to vector<8x256xf32>
    %498 = arith.subf %497, %496 : vector<8x256xf32>
    %499 = vector.shape_cast %37 : vector<1x256xi1> to vector<1x256xi1>
    %500 = vector.broadcast %499 : vector<1x256xi1> to vector<8x256xi1>
    %501 = arith.select %500, %495, %498 : vector<8x256xi1>, vector<8x256xf32>
    %502 = vector.extract_strided_slice %423 {offsets = [0, 5], sizes = [8, 1], strides = [1, 1]} : vector<8x8xf32> to vector<8x1xf32>
    %503 = vector.broadcast %502 : vector<8x1xf32> to vector<8x256xf32>
    %504 = arith.mulf %503, %494 : vector<8x256xf32>
    %505 = vector.extract_strided_slice %424 {offsets = [0, 5], sizes = [8, 1], strides = [1, 1]} : vector<8x8xf32> to vector<8x1xf32>
    %506 = vector.broadcast %505 : vector<8x1xf32> to vector<8x256xf32>
    %507 = arith.mulf %506, %501 : vector<8x256xf32>
    %508 = arith.addf %504, %507 : vector<8x256xf32>
    %c64_i32_93 = arith.constant 64 : i32
    %509 = tpu.dynamic_rotate %508 by %c64_i32_93 dim 1 : vector<8x256xf32>, i32 -> vector<8x256xf32>
    %c192_i32_94 = arith.constant 192 : i32
    %510 = tpu.dynamic_rotate %508 by %c192_i32_94 dim 1 : vector<8x256xf32>, i32 -> vector<8x256xf32>
    %cst_95 = arith.constant 0.000000e+00 : f32
    %511 = vector.broadcast %cst_95 : f32 to vector<8x256xf32>
    %512 = arith.subf %511, %510 : vector<8x256xf32>
    %513 = vector.shape_cast %43 : vector<1x256xi1> to vector<1x256xi1>
    %514 = vector.broadcast %513 : vector<1x256xi1> to vector<8x256xi1>
    %515 = arith.select %514, %509, %512 : vector<8x256xi1>, vector<8x256xf32>
    %516 = vector.extract_strided_slice %423 {offsets = [0, 6], sizes = [8, 1], strides = [1, 1]} : vector<8x8xf32> to vector<8x1xf32>
    %517 = vector.broadcast %516 : vector<8x1xf32> to vector<8x256xf32>
    %518 = arith.mulf %517, %508 : vector<8x256xf32>
    %519 = vector.extract_strided_slice %424 {offsets = [0, 6], sizes = [8, 1], strides = [1, 1]} : vector<8x8xf32> to vector<8x1xf32>
    %520 = vector.broadcast %519 : vector<8x1xf32> to vector<8x256xf32>
    %521 = arith.mulf %520, %515 : vector<8x256xf32>
    %522 = arith.addf %518, %521 : vector<8x256xf32>
    %c128_i32_96 = arith.constant 128 : i32
    %523 = tpu.dynamic_rotate %522 by %c128_i32_96 dim 1 : vector<8x256xf32>, i32 -> vector<8x256xf32>
    %c128_i32_97 = arith.constant 128 : i32
    %524 = tpu.dynamic_rotate %522 by %c128_i32_97 dim 1 : vector<8x256xf32>, i32 -> vector<8x256xf32>
    %cst_98 = arith.constant 0.000000e+00 : f32
    %525 = vector.broadcast %cst_98 : f32 to vector<8x256xf32>
    %526 = arith.subf %525, %524 : vector<8x256xf32>
    %527 = vector.shape_cast %49 : vector<1x256xi1> to vector<1x256xi1>
    %528 = vector.broadcast %527 : vector<1x256xi1> to vector<8x256xi1>
    %529 = arith.select %528, %523, %526 : vector<8x256xi1>, vector<8x256xf32>
    %530 = vector.extract_strided_slice %423 {offsets = [0, 7], sizes = [8, 1], strides = [1, 1]} : vector<8x8xf32> to vector<8x1xf32>
    %531 = vector.broadcast %530 : vector<8x1xf32> to vector<8x256xf32>
    %532 = arith.mulf %531, %522 : vector<8x256xf32>
    %533 = vector.extract_strided_slice %424 {offsets = [0, 7], sizes = [8, 1], strides = [1, 1]} : vector<8x8xf32> to vector<8x1xf32>
    %534 = vector.broadcast %533 : vector<8x1xf32> to vector<8x256xf32>
    %535 = arith.mulf %534, %529 : vector<8x256xf32>
    %536 = arith.addf %532, %535 : vector<8x256xf32>
    %537 = arith.mulf %536, %536 : vector<8x256xf32>
    %c0_99 = arith.constant 0 : index
    %c0_100 = arith.constant 0 : index
    %538 = vector.load %arg7[%c0_99, %c0_100] : memref<1x256xf32, #tpu.memory_space<vmem>>, vector<1x256xf32>
    %539 = vector.broadcast %538 : vector<1x256xf32> to vector<8x256xf32>
    %540 = arith.mulf %537, %539 : vector<8x256xf32>
    %cst_101 = arith.constant dense<0.000000e+00> : vector<8xf32>
    %541 = vector.multi_reduction <add>, %540, %cst_101 [1] : vector<8x256xf32> to vector<8xf32>
    %542 = vector.shape_cast %541 : vector<8xf32> to vector<8x1xf32>
    %c0_102 = arith.constant 0 : index
    %c0_103 = arith.constant 0 : index
    %543 = vector.load %arg8[%c0_102, %c0_103] : memref<1x1xf32, #tpu.memory_space<vmem>>, vector<1x1xf32>
    %544 = vector.broadcast %543 : vector<1x1xf32> to vector<8x1xf32>
    %545 = arith.addf %542, %544 : vector<8x1xf32>
    %c0_104 = arith.constant 0 : index
    %c0_105 = arith.constant 0 : index
    %546 = vector.load %arg9[%c0_104, %c0_105] : memref<8x1xf32, #tpu.memory_space<vmem>>, vector<8x1xf32>
    tpu.vector_store %arg9[%c0_104, %c0_105], %545 {strides = array<i32>} : memref<8x1xf32, #tpu.memory_space<vmem>>, vector<8x1xf32>,
    return
  }
  func.func @transform_0(%arg0: i32) -> (i32, i32) {
    %c0_i32 = arith.constant 0 : i32
    %c0_i32_0 = arith.constant 0 : i32
    return %arg0, %c0_i32 : i32, i32
  }
  func.func @transform_1(%arg0: i32) -> (i32, i32) {
    %c0_i32 = arith.constant 0 : i32
    %c0_i32_0 = arith.constant 0 : i32
    return %arg0, %c0_i32 : i32, i32
  }
  func.func @transform_2(%arg0: i32) -> (i32, i32) {
    %c0_i32 = arith.constant 0 : i32
    %c0_i32_0 = arith.constant 0 : i32
    %c0_i32_1 = arith.constant 0 : i32
    return %c0_i32, %c0_i32_0 : i32, i32
  }
  func.func @transform_3(%arg0: i32) -> (i32, i32) {
    %c0_i32 = arith.constant 0 : i32
    %c0_i32_0 = arith.constant 0 : i32
    %c0_i32_1 = arith.constant 0 : i32
    return %c0_i32, %c0_i32_0 : i32, i32
  }
  func.func @transform_4(%arg0: i32) -> (i32, i32) {
    %c0_i32 = arith.constant 0 : i32
    %c0_i32_0 = arith.constant 0 : i32
    %c0_i32_1 = arith.constant 0 : i32
    return %c0_i32, %c0_i32_0 : i32, i32
  }
  func.func @transform_5(%arg0: i32) -> (i32, i32) {
    %c0_i32 = arith.constant 0 : i32
    %c0_i32_0 = arith.constant 0 : i32
    %c0_i32_1 = arith.constant 0 : i32
    return %c0_i32, %c0_i32_0 : i32, i32
  }
  func.func @transform_6(%arg0: i32) -> (i32, i32) {
    %c0_i32 = arith.constant 0 : i32
    %c0_i32_0 = arith.constant 0 : i32
    %c0_i32_1 = arith.constant 0 : i32
    return %c0_i32, %c0_i32_0 : i32, i32
  }
  func.func @transform_7(%arg0: i32) -> (i32, i32) {
    %c0_i32 = arith.constant 0 : i32
    %c0_i32_0 = arith.constant 0 : i32
    %c0_i32_1 = arith.constant 0 : i32
    return %c0_i32, %c0_i32_0 : i32, i32
  }
  func.func @transform_8(%arg0: i32) -> (i32, i32) {
    %c0_i32 = arith.constant 0 : i32
    %c0_i32_0 = arith.constant 0 : i32
    return %arg0, %c0_i32 : i32, i32
  }
  func.func @transform_9(%arg0: i32) -> (i32, i32) {
    %c0_i32 = arith.constant 0 : i32
    %c0_i32_0 = arith.constant 0 : i32
    return %arg0, %c0_i32 : i32, i32
  }
}

</mosaic_0001>

<bundles_post_ra>
// kernel: tpu_custom_call.1
= control target key start
LH: loop header
LB: loop body
LE: loop exit
PB: predicated region body
PF: predicated region fallthrough
CT: control target
= control target key end

     0   :  { %s2823_s0 = inlined_call_operand.hbm [shape: f32[8,8], index: 0, kind: input, shape index: {}]   ;;  %s2824_s1 = inlined_call_operand.hbm [shape: f32[8,16], index: 1, kind: input, shape index: {}]   ;;  %s2825_s2 = inlined_call_operand.hbm [shape: f32[8,8], index: 2, kind: input, shape index: {}]   ;;  %s2826_s3 = inlined_call_operand.vmem [shape: f32[1,8], index: 3, kind: input, shape index: {}]   ;;  %s2827_s4 = inlined_call_operand.hbm [shape: f32[8,10], index: 4, kind: input, shape index: {}]   ;;  %s2828_s5 = inlined_call_operand.vmem [shape: f32[1,10], index: 5, kind: input, shape index: {}]   ;;  %s2829_s6 = inlined_call_operand.vmem [shape: f32[1,256], index: 6, kind: input, shape index: {}]   ;;  %s2830_s7 = inlined_call_operand.<no memory space> [shape: f32[1,1], index: 7, kind: input, shape index: {}]   ;;  %s2831_s8 = inlined_call_operand.vmem [shape: f32[8,1], index: 8, kind: output, shape index: {0}]   ;;  %s2832_s9 = inlined_call_operand.hbm [shape: f32[8,16], index: 9, kind: output, shape index: {1}]  }
   0x1   :  { %v15_v0 = vstv %s2830_s7 }
   0x2   :  { %16 = vst [vmem:[#allocation2] sm:$0x1] %v15_v0 }
   0x3   :  { %17 = vsyncpa [#allocation4], 0 }
   0x4   :  { %18 = vsyncpa [#allocation7], 0 }
   0x5   :  { %19 = vsyncpa [#allocation10], 0  ;;  %s37_s13 = sshll.u32 %s2824_s1, 4  ;;  %s38_s13 = int_to_ptr.hbm [resolvable:$true] %s37_s13 }
   0x6   :  { %20 = vsyncpa [#allocation5], 0  ;;  %s1887_s14 = smov [#allocation6]   ;;  %s26_s18 = sshll.u32 %s2823_s0, 4  ;;  %s27_s18 = int_to_ptr.hbm [resolvable:$true] %s26_s18 }
   0x7   :  { %s39_s15 = sshll.u32 %s1887_s14, 4  ;;  %s1888_s7 = smov [#allocation3]   ;;  %s40_s15 = int_to_ptr.vmem [resolvable:$true] %s39_s15 }
   0x8   :  { %42 = dma.hbm_to_vmem [thread:$0]  %s38_s13, 128, %s40_s15, [#allocation7]  }
   0x9   :  { %s28_s19 = sshll.u32 %s1888_s7, 4  ;;  %s48_s22 = sshll.u32 %s2825_s2, 4  ;;  %s29_s19 = int_to_ptr.vmem [resolvable:$true] %s28_s19  ;;  %s49_s22 = int_to_ptr.hbm [resolvable:$true] %s48_s22 }
   0xa   :  { %31 = dma.hbm_to_vmem [thread:$0]  %s27_s18, 128, %s29_s19, [#allocation4]  }
   0xb   :  { %s61_s24 = sshll.u32 %s2827_s4, 4  ;;  %s1889_s25 = smov [#allocation8]   ;;  %s62_s24 = int_to_ptr.hbm [resolvable:$true] %s61_s24 }
   0xc   :  { %s50_s26 = sshll.u32 %s1889_s25, 4  ;;  %s1890_s0 = smov [#allocation9]   ;;  %s51_s26 = int_to_ptr.vmem [resolvable:$true] %s50_s26 }
   0xd   :  { %53 = dma.hbm_to_vmem [thread:$0]  %s49_s22, 128, %s51_s26, [#allocation7]  }
   0xe   :  { %s63_s27 = sshll.u32 %s1890_s0, 4  ;;  %s64_s27 = int_to_ptr.vmem [resolvable:$true] %s63_s27 }
   0xf   :  { %66 = dma.hbm_to_vmem [thread:$0]  %s62_s24, 128, %s64_s27, [#allocation10]  }
  0x10   :  { %1879 = dma.done.wait [#allocation4], 128  }
  0x11   :  { %1880 = vsyncadd [#allocation4], 4294967168 }
  0x12   :  { %1881 = dma.done.wait [#allocation7], 256  }
  0x13   :  { %1882 = vsyncadd [#allocation7], 4294967040 }
  0x14   :  { %1883 = dma.done.wait [#allocation10], 128  }
  0x15   :  { %1884 = vsyncadd [#allocation10], 4294967168  ;;  %v1891_v1 = vmov 1   ;;  %v1892_v2 = vmov 0   ;;  %v1994_v3 = vld [vmem:[#allocation3] sm:$0xff]  ;;  %s1906_s28 = smov 126  }
  0x16   :  { %1709 = vset.pattern.permute.xlu1 %v1891_v1  ;;  %1708 = vset.pattern.permute.xlu0 %v1892_v2  ;;  %v1997_v4 = vmul.f32 0.5, %v1994_v3  ;;  %v1893_v16 = vmov 683565275   ;;  %v1894_v18 = vmov 2475754826   ;;  %s1908_s29 = smov 8  }
  0x17   :  { %v1895_v20 = vmov 2131351028   ;;  %v1896_v22 = vmov 2102212464   ;;  %v1897_v24 = vmov 920167782  }
  0x18   :  { %v530_v5 = vand.u32 2139095040, %v1997_v4  ;;  %v527_v7 = vand.u32 2147483647, %v1997_v4  ;;  %v1898_v30 = vmov 1326507024   ;;  %vm529_vm12 = vcmp.lt.s32.totalorder %v1997_v4, 0 }
  0x19   :  { %s1909_s30 = smov 120   ;;  %s1912_s12 = smov 96  }
  0x1a   :  { %v531_v6 = vshrl.u32 %v530_v5, 23  ;;  %v534_v10 = vand.u32 8388607, %v527_v7  ;;  %vm528_vm13 = vcmp.le.f32.partialorder %v527_v7, 0.7853982  ;;  %s1913_s13 = smov 4  }
  0x1b   :  { %s1914_s14 = smov 124   ;;  %s1915_s15 = smov 16  }
  0x1c   :  { %v1662_v8 = vadd.s32 4294967169, %v531_v6  ;;  %v535_v13 = vor.u32 8388608, %v534_v10  ;;  %s1916_s16 = smov 112   ;;  %s1917_s17 = smov 64  }
  0x1d   :  { %s1918_s18 = smov 127   ;;  %s1919_s7 = smov 1  }
  0x1e   :  { %v537_v9 = vadd.s32 1, %v1662_v8  ;;  %v2016_v32 = vshll.u32 %v535_v13, 8  ;;  %s1926_s19 = smov [#allocation11]   ;;  %s1640_s1 = sshll.u32 %s2832_s9, 4  ;;  %s1641_s1 = int_to_ptr.hbm [resolvable:$true] %s1640_s1 }
  0x1f   :  { %s1638_s20 = sshll.u32 %s1926_s19, 4  ;;  %s1639_s20 = int_to_ptr.vmem [resolvable:$true] %s1638_s20 }
  0x20   :  { %vm538_vm0 = vcmp.gt.s32.totalorder %v537_v9, 0  ;;  %v576_v44 = vand.u32 65535, %v2016_v32  ;;  %v577_v45 = vshrl.u32 %v2016_v32, 16 }
  0x21   :  { %v539_v11 = vsel %vm538_vm0, %v537_v9, 0 }
  0x22   :  { %v541_v12 = vand.u32 31, %v539_v11  ;;  %v2003_v14 = vshrl.u32 %v539_v11, 5 }
  0x24   :  { %v542_v15 = vsub.s32 32, %v541_v12  ;;  %v544_v17 = vshll.u32 %v1893_v16, %v541_v12  ;;  %v547_v19 = vshll.u32 %v1894_v18, %v541_v12  ;;  %v550_v21 = vshll.u32 %v1895_v20, %v541_v12 }
  0x25   :  { %v553_v23 = vshll.u32 %v1896_v22, %v541_v12  ;;  %v556_v25 = vshll.u32 %v1897_v24, %v541_v12  ;;  %vm559_vm1 = vcmp.lt.s32.totalorder %v2003_v14, 1  ;;  %vm562_vm2 = vcmp.lt.s32.totalorder %v2003_v14, 4 }
  0x26   :  { %v545_v26 = vshrl.u32 %v1894_v18, %v542_v15  ;;  %v548_v27 = vshrl.u32 %v1895_v20, %v542_v15  ;;  %v551_v28 = vshrl.u32 %v1896_v22, %v542_v15  ;;  %v554_v29 = vshrl.u32 %v1897_v24, %v542_v15 }
  0x27   :  { %v557_v31 = vshrl.u32 %v1898_v30, %v542_v15  ;;  %vm561_vm3 = vcmp.lt.s32.totalorder %v2003_v14, 3  ;;  %vm560_vm4 = vcmp.lt.s32.totalorder %v2003_v14, 2  ;;  %v543_v52 = vshrl.u32 %v1893_v16, %v542_v15 }
  0x28   :  { %v546_v33 = vor.u32 %v545_v26, %v544_v17  ;;  %v549_v34 = vor.u32 %v548_v27, %v547_v19  ;;  %v552_v35 = vor.u32 %v551_v28, %v550_v21  ;;  %v555_v36 = vor.u32 %v554_v29, %v553_v23 }
  0x29   :  { %v558_v37 = vor.u32 %v557_v31, %v556_v25 }
  0x2a   :  { %v567_v38 = vsel %vm559_vm1, %v546_v33, %v549_v34  ;;  %v571_v39 = vsel %vm559_vm1, %v549_v34, %v552_v35  ;;  %v568_v40 = vsel %vm562_vm2, %v555_v36, 920167782  ;;  %v563_v5 = vsel %vm559_vm1, %v543_v52, %v546_v33 }
  0x2b   :  { %v572_v41 = vsel %vm562_vm2, %v558_v37, 1326507024  ;;  %v569_v42 = vsel %vm561_vm3, %v552_v35, %v568_v40  ;;  %v564_v8 = vsel %vm562_vm2, %v552_v35, 2102212464 }
  0x2c   :  { %v573_v43 = vsel %vm561_vm3, %v555_v36, %v572_v41  ;;  %v570_v46 = vsel %vm560_vm4, %v567_v38, %v569_v42  ;;  %v565_v21 = vsel %vm561_vm3, %v549_v34, %v564_v8 }
  0x2d   :  { %v574_v47 = vsel %vm560_vm4, %v571_v39, %v573_v43  ;;  %v600_v50 = vand.u32 65535, %v570_v46  ;;  %v601_v51 = vshrl.u32 %v570_v46, 16  ;;  %v566_v33 = vsel %vm560_vm4, %v563_v5, %v565_v21 }
  0x2e   :  { %v578_v48 = vand.u32 65535, %v574_v47  ;;  %v579_v49 = vshrl.u32 %v574_v47, 16  ;;  %v620_v38 = vmul.u32 %v2016_v32, %v566_v33  ;;  %vm670_vm4 = vweird.f32 %v1997_v4 }
  0x2f   :  { %v602_v56 = vmul.u32 %v600_v50, %v576_v44  ;;  %v603_v57 = vmul.u32 %v601_v51, %v576_v44  ;;  %v604_v58 = vmul.u32 %v600_v50, %v577_v45  ;;  %v605_v62 = vmul.u32 %v601_v51, %v577_v45 }
  0x30   :  { %v580_v53 = vmul.u32 %v578_v48, %v576_v44  ;;  %v581_v54 = vmul.u32 %v579_v49, %v576_v44  ;;  %v582_v55 = vmul.u32 %v578_v48, %v577_v45  ;;  %v583_v59 = vmul.u32 %v579_v49, %v577_v45 }
  0x31   :  { %v606_v63 = vshll.u32 %v603_v57, 16  ;;  %v608_v0 = vshll.u32 %v604_v58, 16  ;;  %v607_v17 = vshrl.u32 %v603_v57, 16  ;;  %v609_v27 = vshrl.u32 %v604_v58, 16 }
  0x32   :  { %v584_v60 = vshll.u32 %v581_v54, 16  ;;  %v586_v61 = vshll.u32 %v582_v55, 16  ;;  %v585_v11 = vshrl.u32 %v581_v54, 16  ;;  %v587_v23 = vshrl.u32 %v582_v55, 16 }
  0x33   :  { %vm610_vm6 = vc.u32 %v602_v56, %v606_v63  ;;  %v612_v10 = vadd.s32 %v606_v63, %v602_v56 }
  0x34   :  { %vm588_vm5 = vc.u32 %v580_v53, %v584_v60  ;;  %v590_v6 = vadd.s32 %v584_v60, %v580_v53  ;;  %v611_v13 = vsel %vm610_vm6, 1, %v1892_v2 }
  0x35   :  { %v589_v9 = vsel %vm588_vm5, 1, %v1892_v2  ;;  %v613_v19 = vadd.s32 %v611_v13, %v605_v62  ;;  %vm614_vm8 = vc.u32 %v612_v10, %v608_v0  ;;  %v616_v31 = vadd.s32 %v612_v10, %v608_v0 }
  0x36   :  { %v591_v12 = vadd.s32 %v589_v9, %v583_v59  ;;  %vm592_vm7 = vc.u32 %v590_v6, %v586_v61  ;;  %v615_v26 = vsel %vm614_vm8, 1, %v1892_v2  ;;  %v1899_v6 = vmov 2  }
  0x37   :  { %v593_v15 = vsel %vm592_vm7, 1, %v1892_v2  ;;  %v617_v28 = vadd.s32 %v615_v26, %v613_v19  ;;  %1710 = vset.pattern.permute.xlu2 %v1899_v6  ;;  %vm144_vm5 = vcmask 64512  }
  0x38   :  { %v595_v25 = vadd.s32 %v593_v15, %v591_v12 }
  0x39   :  { %v618_v35 = vadd.s32 %v617_v28, %v607_v17 }
  0x3a   :  { %v596_v29 = vadd.s32 %v595_v25, %v585_v11 }
  0x3b   :  { %v619_v37 = vadd.s32 %v618_v35, %v609_v27 }
  0x3c   :  { %v597_v36 = vadd.s32 %v596_v29, %v587_v23 }
  0x3d   :  { %v623_v39 = vadd.s32 1, %v619_v37 }
  0x3e   :  { %vm622_vm9 = vc.u32 %v597_v36, %v616_v31  ;;  %v621_v14 = vadd.s32 %v616_v31, %v597_v36 }
  0x3f   :  { %v624_v40 = vsel %vm622_vm9, %v623_v39, %v619_v37 }
  0x40   :  { %v625_v34 = vadd.s32 %v624_v40, %v620_v38 }
  0x42   :  { %v626_v41 = vadd.s32 536870912, %v625_v34 }
  0x44   :  { %v627_v42 = vshrl.u32 %v626_v41, 30 }
  0x46   :  { %v628_v43 = vshll.u32 %v627_v42, 30  ;;  %v651_v60 = vsub.s32 4, %v627_v42 }
  0x48   :  { %v629_v44 = vsub.s32 %v625_v34, %v628_v43  ;;  %v652_v63 = vsel %vm529_vm12, %v651_v60, %v627_v42 }
  0x49   :  { %v654_v8 = vsel %vm528_vm13, 0, %v652_v63 }
  0x4a   :  { %vm630_vm10 = vcmp.lt.s32.totalorder %v629_v44, 0  ;;  %v631_v45 = vsub.s32 0, %v629_v44  ;;  %v825_v13 = vadd.s32 3, %v654_v8  ;;  %v671_v7 = vand.u32 3, %v654_v8 }
  0x4c   :  { %v632_v46 = vsel %vm630_vm10, %v631_v45, %v629_v44  ;;  %v826_v23 = vand.u32 3, %v825_v13  ;;  %vm676_vm14 = vcmp.eq.s32.totalorder %v671_v7, 2  ;;  %vm672_vm0 = vcmp.lt.s32.totalorder %v671_v7, 2 }
  0x4d   :  { %v633_v47 = vclz %v632_v46  ;;  %vm673_vm1 = vcmp.eq.s32.totalorder %v671_v7, 0  ;;  %v1900_v45 = vmov 3   ;;  %v1902_v46 = vmov 5  }
  0x4e   :  { %vm831_vm15 = vcmp.eq.s32.totalorder %v826_v23, 2  ;;  %vm828_vm2 = vcmp.eq.s32.totalorder %v826_v23, 0  ;;  %vm827_vm3 = vcmp.lt.s32.totalorder %v826_v23, 2  ;;  %v168_v23 = vld [vmem:[#allocation9] sm:$0xff] }
  0x4f   :  { %v1663_v48 = vadd.s32 4294967294, %v633_v47  ;;  %v1903_v47 = vmov 6   ;;  %191 = vmatpush.msra.mxu1 %v168_v23 }
  0x51   :  { %vm1664_vm11 = vcmp.lt.s32.totalorder %v1663_v48, 0 }
  0x52   :  { %v636_v49 = vsel %vm1664_vm11, 0, %v1663_v48 }
  0x53   :  { %v637_v50 = vsub.s32 32, %v636_v49  ;;  %v638_v51 = vshll.u32 %v629_v44, %v636_v49  ;;  %v641_v52 = vsub.s32 4294967266, %v636_v49  ;;  %v139_v44 = vld [vmem:[#allocation8] sm:$0xff] }
  0x54   :  { %163 = vmatpush.msra.mxu0 %v139_v44 }
  0x55   :  { %v639_v32 = vshrl.u32 %v621_v14, %v637_v50  ;;  %v642_v53 = vadd.s32 127, %v641_v52  ;;  %1654 = vmatmul.msk.f32.vlgmr.msra.gmra.mxu0 %vm144_vm5, %v1994_v3  ;;  %v1904_v3 = vmov 7   ;;  %v90_v50 = vlaneseq }
  0x57   :  { %v640_v54 = vor.u32 %v639_v32, %v638_v51  ;;  %v643_v55 = vshll.u32 %v642_v53, 23  ;;  %v2072_v32 = vand.u32 127, %v90_v50 }
  0x59   :  { %v644_v56 = vor.u32 4788187, %v643_v55  ;;  %v647_v57 = vcvt.s32.f32 %v640_v54  ;;  %v2077_v54 = vadd.s32 128, %v2072_v32  ;;  %v93_v55 = vand.u32 1, %v2072_v32 }
  0x5a   :  { %v109_v63 = vshra.s32 %v2072_v32, 3 }
  0x5b   :  { %v645_v58 = vand.u32 2147483647, %v644_v56  ;;  %v94_v56 = vand.u32 1, %v2077_v54  ;;  %v98_v60 = vshra.s32 %v2077_v54, 1  ;;  %vm2086_vm6 = vcmp.eq.s32.totalorder %v93_v55, 1 }
  0x5c   :  { %v116_v7 = vshra.s32 %v2077_v54, 4 }
  0x5d   :  { %v648_v59 = vmul.f32 %v647_v57, %v645_v58  ;;  %v97_v57 = vshra.s32 %v2072_v32, 1  ;;  %vm2090_vm7 = vcmp.eq.s32.totalorder %v94_v56, 1 }
  0x5f   :  { %v649_v61 = vxor.u32 2147483648, %v648_v59  ;;  %v2094_v8 = vand.u32 1, %v97_v57 }
  0x61   :  { %v650_v62 = vsel %vm529_vm12, %v649_v61, %v648_v59  ;;  %v103_v59 = vshra.s32 %v2072_v32, 2  ;;  %vm2848_vm8 = vcmp.eq.s32.totalorder %v2094_v8, 1 }
  0x62   :  { %v653_v0 = vsel %vm528_vm13, %v1997_v4, %v650_v62  ;;  %v1901_v4 = vmov 4   ;;  %v104_v62 = vshra.s32 %v2077_v54, 2 }
  0x63   :  { %v655_v5 = vmul.f32 %v653_v0, %v653_v0 }
  0x64   :  { %v2103_v13 = vand.u32 1, %v104_v62  ;;  %v134_v62 = vshra.s32 %v2077_v54, 7 }
  0x65   :  { %v656_v9 = vmul.f32 -0.001358992, %v655_v5  ;;  %v663_v10 = vmul.f32 -0.00019511016, %v655_v5 }
  0x66   :  { %vm2843_vm11 = vcmp.eq.s32.totalorder %v2103_v13, 1 }
  0x67   :  { %v657_v11 = vadd.f32 0.041655596, %v656_v9  ;;  %v664_v12 = vadd.f32 0.008332121, %v663_v10  ;;  %v2096_v9 = vand.u32 1, %v103_v59  ;;  %v2098_v10 = vand.u32 1, %v98_v60 }
  0x69   :  { %v658_v15 = vmul.f32 %v657_v11, %v655_v5  ;;  %v665_v17 = vmul.f32 %v664_v12, %v655_v5  ;;  %v110_v11 = vshra.s32 %v2077_v54, 3  ;;  %vm2847_vm9 = vcmp.eq.s32.totalorder %v2098_v10, 1 }
  0x6a   :  { %vm2844_vm10 = vcmp.eq.s32.totalorder %v2096_v9, 1 }
  0x6b   :  { %v659_v19 = vadd.f32 -0.4999988, %v658_v15  ;;  %v666_v21 = vadd.f32 -0.16666654, %v665_v17 }
  0x6d   :  { %v660_v25 = vmul.f32 %v659_v19, %v655_v5  ;;  %v667_v26 = vmul.f32 %v666_v21, %v655_v5  ;;  %v2109_v19 = vand.u32 1, %v109_v63  ;;  %v115_v21 = vshra.s32 %v2072_v32, 4 }
  0x6f   :  { %v661_v27 = vadd.f32 1.0, %v660_v25  ;;  %v668_v28 = vadd.f32 1.0, %v667_v26  ;;  %vm2841_vm12 = vcmp.eq.s32.totalorder %v2109_v19, 1 }
  0x71   :  { %v669_v29 = vmul.f32 %v668_v28, %v653_v0  ;;  %v677_v31 = vxor.u32 2147483648, %v661_v27  ;;  %v1920_v0 = vmov 10  }
  0x73   :  { %v674_v33 = vxor.u32 2147483648, %v669_v29  ;;  %v678_v35 = vsel %vm676_vm14, %v677_v31, %v669_v29  ;;  %v833_v36 = vsel %vm831_vm15, %v677_v31, %v669_v29  ;;  %v1756_v29 = vld [vmem:[%s2826_s3] ss:$0 sm:$0xff]  ;;  %s1905_s3 = smov 2  }
  0x75   :  { %v675_v37 = vsel %vm673_vm1, %v661_v27, %v674_v33  ;;  %v830_v38 = vsel %vm828_vm2, %v661_v27, %v674_v33  ;;  %v2115_v27 = vand.u32 1, %v110_v11  ;;  %v2123_v33 = vand.u32 1, %v115_v21 }
  0x76   :  { %v679_v39 = vsel %vm672_vm0, %v675_v37, %v678_v35  ;;  %v834_v40 = vsel %vm827_vm3, %v830_v38, %v833_v36  ;;  %v2125_v35 = vand.u32 1, %v116_v7  ;;  %v121_v36 = vshra.s32 %v2072_v32, 5 }
  0x77   :  { %v680_v34 = vsel %vm670_vm4, nan, %v679_v39  ;;  %v835_v41 = vsel %vm670_vm4, nan, %v834_v40  ;;  %v122_v37 = vshra.s32 %v2077_v54, 5  ;;  %v127_v40 = vshra.s32 %v2072_v32, 6 }
  0x78   :  { %v837_v42 = vadd.f32 %v835_v41, %v680_v34  ;;  %v836_v43 = vsub.f32 %v680_v34, %v835_v41  ;;  %v128_v34 = vshra.s32 %v2077_v54, 6  ;;  %vm114_vm13 = vcmp.eq.s32.totalorder %v2115_v27, 1 }
  0x79   :  { %vm119_vm14 = vcmp.eq.s32.totalorder %v2123_v33, 1  ;;  %vm2833_vm15 = vcmp.eq.s32.totalorder %v2125_v35, 1  ;;  %v2151_v59 = vand.u32 1, %v127_v40  ;;  %v1924_v27 = vmov 14  }
  0x7a   :  { %861 = vperm.xlu1 %1709, %v837_v42   ;;  %844 = vperm.xlu0 %1708, %v837_v42   ;;  %v1925_v33 = vmov 15  }
  0x7b   :  { %877 = vperm.xlu2 %1710, %v837_v42   ;;  %vm2852_vm2 = vcmp.eq.s32.totalorder %v2151_v59, 1 }
  0x82   :  { %865 = vperm.xlu1 %1709, %v836_v43   ;;  %849 = vperm.xlu0 %1708, %v836_v43  }
  0x83   :  { %881 = vperm.xlu2 %1710, %v836_v43  }
  0x8a   :  { %1712 = vset.pattern.permute.xlu1 %v1900_v45  ;;  %1711 = vset.pattern.permute.xlu0 %v1900_v45 }
  0x8b   :  { %897 = vperm.xlu1 %1712, %v836_v43   ;;  %893 = vperm.xlu0 %1711, %v837_v42  }
  0x8c   :  { %1713 = vset.pattern.permute.xlu2 %v1901_v4 }
  0x8d   :  { %909 = vperm.xlu2 %1713, %v837_v42  }
  0x93   :  { %1714 = vset.pattern.permute.xlu1 %v1901_v4  ;;  %1716 = vset.pattern.permute.xlu0 %v1902_v46 }
  0x94   :  { %913 = vperm.xlu1 %1714, %v836_v43   ;;  %929 = vperm.xlu0 %1716, %v836_v43  }
  0x95   :  { %1715 = vset.pattern.permute.xlu2 %v1902_v46 }
  0x96   :  { %925 = vperm.xlu2 %1715, %v837_v42  }
  0x9c   :  { %1717 = vset.pattern.permute.xlu1 %v1903_v47  ;;  %1724 = vset.pattern.permute.xlu0 %v1892_v2 }
  0x9d   :  { %941 = vperm.xlu1 %1717, %v837_v42  }
  0x9e   :  { %1718 = vset.pattern.permute.xlu2 %v1903_v47 }
  0x9f   :  { %945 = vperm.xlu2 %1718, %v836_v43  }
  0xa5   :  { %1719 = vset.pattern.permute.xlu1 %v1904_v3 }
  0xa6   :  { %957 = vperm.xlu1 %1719, %v837_v42  }
  0xa7   :  { %1720 = vset.pattern.permute.xlu2 %v1904_v3 }
  0xa8   :  { %961 = vperm.xlu2 %1720, %v836_v43  }
  0xd2   :  { %v165_v41 = vpop.f32.mrf.mxu0 }
  0xd3   :  { %v166_v44 = vadd.f32 %v1756_v29, %v165_v41 }
  0xd5   :  { %v878_v48 = vpop.permute.xlu2 %877  ;;  %1655 = vmatmul.msk.f32.vlgmr.msra.gmra.mxu1 %vm144_vm5, %v166_v44 }
  0xdd   :  { %v882_v49 = vpop.permute.xlu2 %881 }
  0xde   :  { %v884_v50 = vsel %vm2844_vm10, %v878_v48, %v882_v49 }
  0xe7   :  { %v2074_v53 = vpop.permute.xlu2 %909 }
  0xec   :  { %v862_v14 = vpop.permute.xlu1 %861  ;;  %v845_v51 = vpop.permute.xlu0 %844 }
  0xf0   :  { %v2101_v12 = vpop.permute.xlu2 %925 }
  0xf4   :  { %v866_v52 = vpop.permute.xlu1 %865  ;;  %v850_v61 = vpop.permute.xlu0 %849 }
  0xf5   :  { %v852_v15 = vsel %vm2086_vm6, %v845_v51, %v850_v61  ;;  %v853_v17 = vsel %vm2090_vm7, %v845_v51, %v850_v61  ;;  %v868_v38 = vsel %vm2848_vm8, %v862_v14, %v866_v52  ;;  %v869_v39 = vsel %vm2847_vm9, %v862_v14, %v866_v52 }
  0xf6   :  { %v854_v25 = vmul.f32 0.0625, %v852_v15  ;;  %v855_v26 = vmul.f32 0.0625, %v853_v17  ;;  %v885_v51 = vsel %vm2843_vm11, %v878_v48, %v882_v49  ;;  %v2142_v14 = vand.u32 1, %v121_v36 }
  0xf7   :  { %v2144_v52 = vand.u32 1, %v122_v37  ;;  %v2153_v48 = vand.u32 1, %v128_v34  ;;  %v133_v61 = vshra.s32 %v2072_v32, 7 }
  0xf8   :  { %v870_v42 = vmul.f32 %v868_v38, %v854_v25  ;;  %v871_v43 = vmul.f32 %v869_v39, %v855_v26  ;;  %vm125_vm0 = vcmp.eq.s32.totalorder %v2142_v14, 1  ;;  %v2169_v25 = vand.u32 1, %v134_v62 }
  0xf9   :  { %v946_v55 = vpop.permute.xlu2 %945  ;;  %vm126_vm1 = vcmp.eq.s32.totalorder %v2144_v52, 1  ;;  %vm2851_vm3 = vcmp.eq.s32.totalorder %v2153_v48, 1  ;;  %v2167_v23 = vand.u32 1, %v133_v61 }
  0xfa   :  { %v886_v49 = vmul.f32 %v884_v50, %v870_v42  ;;  %v887_v60 = vmul.f32 %v885_v51, %v871_v43  ;;  %v1907_v43 = vmov 9  }
  0xfb   :  { %vm2834_vm4 = vcmp.eq.s32.totalorder %v2167_v23, 1  ;;  %1721 = vset.pattern.permute.xlu2 %v1907_v43 }
  0xfd   :  { %v898_v58 = vpop.permute.xlu1 %897  ;;  %v894_v31 = vpop.permute.xlu0 %893 }
  0xfe   :  { %v900_v56 = vsel %vm2841_vm12, %v894_v31, %v898_v58  ;;  %v901_v57 = vsel %vm114_vm13, %v894_v31, %v898_v58 }
  0xff   :  { %v902_v58 = vmul.f32 %v900_v56, %v886_v49  ;;  %v903_v17 = vmul.f32 %v901_v57, %v887_v60 }
 0x102   :  { %v962_v37 = vpop.permute.xlu2 %961 }
 0x106   :  { %v914_v28 = vpop.permute.xlu1 %913  ;;  %v930_v7 = vpop.permute.xlu0 %929 }
 0x107   :  { %v916_v63 = vsel %vm119_vm14, %v2074_v53, %v914_v28  ;;  %v917_v11 = vsel %vm2833_vm15, %v2074_v53, %v914_v28  ;;  %v932_v53 = vsel %vm125_vm0, %v2101_v12, %v930_v7  ;;  %v933_v26 = vsel %vm126_vm1, %v2101_v12, %v930_v7 }
 0x108   :  { %v918_v54 = vmul.f32 %v916_v63, %v902_v58  ;;  %v919_v21 = vmul.f32 %v917_v11, %v903_v17  ;;  %vm2835_vm15 = vcmp.eq.s32.totalorder %v2169_v25, 1 }
 0x10a   :  { %v934_v31 = vmul.f32 %v932_v53, %v918_v54  ;;  %v935_v36 = vmul.f32 %v933_v26, %v919_v21  ;;  %v2849_v54 = vmov 8  }
 0x10b   :  { %1722 = vset.pattern.permute.xlu1 %v2849_v54 }
 0x10f   :  { %v942_v15 = vpop.permute.xlu1 %941 }
 0x110   :  { %v948_v28 = vsel %vm2852_vm2, %v942_v15, %v946_v55  ;;  %v949_v29 = vsel %vm2851_vm3, %v942_v15, %v946_v55  ;;  %v1757_v15 = vld [vmem:[%s2828_s5] ss:$0 sm:$0xff]  ;;  %s1911_s5 = smov 32  }
 0x111   :  { %v950_v38 = vmul.f32 %v948_v28, %v934_v31  ;;  %v951_v39 = vmul.f32 %v949_v29, %v935_v36 }
 0x118   :  { %v958_v40 = vpop.permute.xlu1 %957 }
 0x119   :  { %v964_v34 = vsel %vm2834_vm4, %v958_v40, %v962_v37  ;;  %v965_v12 = vsel %vm2835_vm15, %v958_v40, %v962_v37  ;;  %vm2836_vm4 = vcmp.lt.s32.totalorder %v2072_v32, 2  ;;  %vm2837_vm15 = vcmp.lt.s32.totalorder %v2072_v32, 126 }
 0x11a   :  { %v966_v41 = vmul.f32 %v964_v34, %v950_v38  ;;  %v967_v42 = vmul.f32 %v965_v12, %v951_v39 }
 0x11c   :  { %970 = vrot.lane.b32.xlu1 %v967_v42, %s1905_s3  ;;  %975 = vrot.lane.b32.xlu2 %v966_v41, %s1906_s28 }
 0x11d   :  { %968 = vrot.lane.b32.xlu0 %v966_v41, %s1905_s3 }
 0x125   :  { %977 = vrot.lane.b32.xlu0 %v967_v42, %s1906_s28 }
 0x152   :  { %v193_v58 = vpop.f32.mrf.mxu1 }
 0x153   :  { %v194_v17 = vadd.f32 %v1757_v15, %v193_v58 }
 0x176   :  { %v976_v51 = vpop.permute.xlu2 %975 }
 0x18e   :  { %v971_v50 = vpop.permute.xlu1 %970 }
 0x18f   :  { %v969_v44 = vpop.permute.xlu0 %968 }
 0x190   :  { %v973_v56 = vsel %vm2836_vm4, %v969_v44, %v971_v50  ;;  %v974_v57 = vsel %vm2836_vm4, %v971_v50, %v969_v44  ;;  %vm2838_vm4 = vcmp.lt.s32.totalorder %v2072_v32, 8 }
 0x197   :  { %v978_v55 = vpop.permute.xlu0 %977 }
 0x198   :  { %v980_v49 = vsel %vm2837_vm15, %v976_v51, %v978_v55  ;;  %v981_v60 = vsel %vm2837_vm15, %v978_v55, %v976_v51  ;;  %vm2839_vm15 = vcmp.lt.s32.totalorder %v2072_v32, 120 }
 0x199   :  { %v983_v61 = vsel %vm2847_vm9, %v973_v56, %v981_v60  ;;  %v982_v62 = vsel %vm2848_vm8, %v974_v57, %v980_v49  ;;  %v212_v60 = vld [vmem:[#allocation6] sm:$0xff] }
 0x19a   :  { %v985_v63 = vsel %vm2090_vm7, %v983_v61, %v967_v42  ;;  %v984_v11 = vsel %vm2086_vm6, %v982_v62, %v966_v41 }
 0x19b   :  { %988 = vrot.lane.b32.xlu2 %v985_v63, %s1908_s29  ;;  %993 = vrot.lane.b32.xlu0 %v984_v11, %s1909_s30 }
 0x19c   :  { %986 = vrot.lane.b32.xlu1 %v984_v11, %s1908_s29 }
 0x1a3   :  { %203 = vperm.xlu2 %1721, %v194_v17  }
 0x1a4   :  { %995 = vrot.lane.b32.xlu1 %v985_v63, %s1909_s30 }
 0x1ab   :  { %1723 = vset.pattern.permute.xlu2 %v1892_v2 }
 0x1f5   :  { %v989_v7 = vpop.permute.xlu2 %988 }
 0x1fd   :  { %v204_v34 = vpop.permute.xlu2 %203 }
 0x1fe   :  { %v206_v12 = vmul.f32 %v204_v34, %v194_v17 }
 0x20d   :  { %v994_v53 = vpop.permute.xlu0 %993 }
 0x20e   :  { %v987_v21 = vpop.permute.xlu1 %986 }
 0x20f   :  { %v991_v28 = vsel %vm2838_vm4, %v987_v21, %v989_v7  ;;  %v992_v29 = vsel %vm2838_vm4, %v989_v7, %v987_v21  ;;  %vm2840_vm4 = vcmp.lt.s32.totalorder %v2072_v32, 32 }
 0x216   :  { %v996_v26 = vpop.permute.xlu1 %995 }
 0x217   :  { %v998_v31 = vsel %vm2839_vm15, %v994_v53, %v996_v26  ;;  %v999_v36 = vsel %vm2839_vm15, %v996_v26, %v994_v53  ;;  %vm2842_vm15 = vcmp.lt.s32.totalorder %v2072_v32, 96 }
 0x218   :  { %v1001_v37 = vsel %vm114_vm13, %v991_v28, %v999_v36  ;;  %v1000_v38 = vsel %vm2841_vm12, %v992_v29, %v998_v31  ;;  %vm214_vm12 = vcmask 130048  }
 0x219   :  { %v1003_v39 = vsel %vm2843_vm11, %v1001_v37, %v985_v63  ;;  %v1002_v40 = vsel %vm2844_vm10, %v1000_v38, %v984_v11 }
 0x21a   :  { %1006 = vrot.lane.b32.xlu1 %v1003_v39, %s1911_s5  ;;  %1004 = vrot.lane.b32.xlu0 %v1002_v40, %s1911_s5 }
 0x21b   :  { %1011 = vrot.lane.b32.xlu2 %v1002_v40, %s1912_s12 }
 0x222   :  { %1013 = vrot.lane.b32.xlu0 %v1003_v39, %s1912_s12  ;;  %198 = vperm.xlu1 %1722, %v194_v17  }
 0x223   :  { %208 = vrot.lane.b32.xlu2 %v206_v12, %s1908_s29 }
 0x22a   :  { %1726 = vset.pattern.permute.xlu1 %v1891_v1 }
 0x275   :  { %v1012_v44 = vpop.permute.xlu2 %1011 }
 0x27d   :  { %v209_v62 = vpop.permute.xlu2 %208 }
 0x28c   :  { %v1007_v41 = vpop.permute.xlu1 %1006  ;;  %v1005_v42 = vpop.permute.xlu0 %1004 }
 0x28d   :  { %v1009_v50 = vsel %vm2840_vm4, %v1005_v42, %v1007_v41  ;;  %v1010_v56 = vsel %vm2840_vm4, %v1007_v41, %v1005_v42  ;;  %vm2859_vm4 = vcmp.eq.s32.totalorder %v2125_v35, 1 }
 0x294   :  { %v1014_v51 = vpop.permute.xlu0 %1013  ;;  %v199_v55 = vpop.permute.xlu1 %198 }
 0x295   :  { %v1016_v57 = vsel %vm2842_vm15, %v1012_v44, %v1014_v51  ;;  %v1017_v49 = vsel %vm2842_vm15, %v1014_v51, %v1012_v44  ;;  %v201_v61 = vmul.f32 %v199_v55, %v194_v17 }
 0x296   :  { %v1018_v63 = vsel %vm125_vm0, %v1010_v56, %v1016_v57  ;;  %v1019_v11 = vsel %vm126_vm1, %v1009_v50, %v1017_v49 }
 0x297   :  { %v211_v15 = vsel %vm144_vm5, %v201_v61, %v209_v62  ;;  %v1020_v58 = vsel %vm119_vm14, %v1018_v63, %v1002_v40  ;;  %v1021_v21 = vsel %vm2859_vm4, %v1019_v11, %v1003_v39  ;;  %vm2845_vm5 = vcmp.lt.s32.totalorder %v2072_v32, 4 }
 0x298   :  { %v213_v7 = vadd.f32 %v212_v60, %v211_v15  ;;  %v1023_v17 = vsel %vm2851_vm3, %v1020_v58, %v1021_v21  ;;  %v1022_v53 = vsel %vm2852_vm2, %v1021_v21, %v1020_v58  ;;  %vm2846_vm4 = vcmp.lt.s32.totalorder %v2072_v32, 124 }
 0x299   :  { %1026 = vrot.lane.b32.xlu1 %v1023_v17, %s1913_s13  ;;  %1031 = vrot.lane.b32.xlu2 %v1022_v53, %s1914_s14 }
 0x29a   :  { %1024 = vrot.lane.b32.xlu0 %v1022_v53, %s1913_s13  ;;  %215 = vst.msk [vmem:[#allocation11] sm:$0xff] %vm214_vm12, %v213_v7  ;;  %v2300_v42 = vmul.f32 0.5, %v213_v7 }
 0x29b   :  { %1643 = dma.vmem_to_hbm [thread:$0]  %s1639_s20, 128, %s1641_s1, [#allocation5]  }
 0x29c   :  { %v220_v44 = vand.u32 2139095040, %v2300_v42  ;;  %v217_v61 = vand.u32 2147483647, %v2300_v42 }
 0x29e   :  { %v221_v50 = vshrl.u32 %v220_v44, 23 }
 0x2a0   :  { %v1656_v51 = vadd.s32 4294967169, %v221_v50 }
 0x2a2   :  { %1033 = vrot.lane.b32.xlu0 %v1023_v17, %s1914_s14  ;;  %v227_v55 = vadd.s32 1, %v1656_v51 }
 0x2a4   :  { %vm228_vm12 = vcmp.gt.s32.totalorder %v227_v55, 0 }
 0x2a5   :  { %v229_v56 = vsel %vm228_vm12, %v227_v55, 0 }
 0x2a6   :  { %v231_v57 = vand.u32 31, %v229_v56  ;;  %v2311_v11 = vshrl.u32 %v229_v56, 5 }
 0x2a8   :  { %v2303_v49 = vsub.s32 32, %v231_v57  ;;  %v243_v62 = vshll.u32 %v1896_v22, %v231_v57  ;;  %vm252_vm12 = vcmp.lt.s32.totalorder %v2311_v11, 4  ;;  %vm249_vm15 = vcmp.lt.s32.totalorder %v2311_v11, 1 }
 0x2aa   :  { %v244_v60 = vshrl.u32 %v1897_v24, %v2303_v49  ;;  %v247_v63 = vshrl.u32 %v1898_v30, %v2303_v49  ;;  %v235_v15 = vshrl.u32 %v1894_v18, %v2303_v49  ;;  %v238_v58 = vshrl.u32 %v1895_v20, %v2303_v49 }
 0x2ab   :  { %v241_v21 = vshrl.u32 %v1896_v22, %v2303_v49  ;;  %v240_v30 = vshll.u32 %v1895_v20, %v231_v57 }
 0x2ac   :  { %v245_v7 = vor.u32 %v244_v60, %v243_v62 }
 0x2ae   :  { %v258_v22 = vsel %vm252_vm12, %v245_v7, 920167782 }
 0x2f3   :  { %v1032_v29 = vpop.permute.xlu2 %1031 }
 0x30b   :  { %v1027_v28 = vpop.permute.xlu1 %1026 }
 0x30c   :  { %v1025_v26 = vpop.permute.xlu0 %1024 }
 0x30d   :  { %v1029_v36 = vsel %vm2845_vm5, %v1025_v26, %v1027_v28  ;;  %v1030_v37 = vsel %vm2845_vm5, %v1027_v28, %v1025_v26  ;;  %v237_v26 = vshll.u32 %v1894_v18, %v231_v57  ;;  %v224_v28 = vand.u32 8388607, %v217_v61 }
 0x30f   :  { %v225_v20 = vor.u32 8388608, %v224_v28 }
 0x311   :  { %v2350_v44 = vshll.u32 %v225_v20, 8 }
 0x313   :  { %v266_v55 = vand.u32 65535, %v2350_v44 }
 0x314   :  { %v1034_v31 = vpop.permute.xlu0 %1033 }
 0x315   :  { %v1036_v38 = vsel %vm2846_vm4, %v1032_v29, %v1034_v31  ;;  %v1037_v39 = vsel %vm2846_vm4, %v1034_v31, %v1032_v29 }
 0x316   :  { %v1039_v40 = vsel %vm2843_vm11, %v1029_v36, %v1037_v39  ;;  %v1038_v34 = vsel %vm2844_vm10, %v1030_v37, %v1036_v38  ;;  %v2327_v36 = vor.u32 %v238_v58, %v237_v26  ;;  %v242_v37 = vor.u32 %v241_v21, %v240_v30 }
 0x317   :  { %v2286_v12 = vsel %vm2847_vm9, %v1039_v40, %v1023_v17  ;;  %v2290_v41 = vsel %vm2848_vm8, %v1038_v34, %v1022_v53  ;;  %v246_v17 = vshll.u32 %v1897_v24, %v231_v57  ;;  %v234_v53 = vshll.u32 %v1893_v16, %v231_v57 }
 0x318   :  { %1044 = vrot.lane.b32.xlu2 %v2286_v12, %s1915_s15  ;;  %1049 = vrot.lane.b32.xlu0 %v2290_v41, %s1916_s16  ;;  %vm251_vm11 = vcmp.lt.s32.totalorder %v2311_v11, 3  ;;  %vm250_vm10 = vcmp.lt.s32.totalorder %v2311_v11, 2  ;;  %v261_v39 = vsel %vm249_vm15, %v2327_v36, %v242_v37 }
 0x319   :  { %1042 = vrot.lane.b32.xlu1 %v2290_v41, %s1915_s15  ;;  %v248_v29 = vor.u32 %v247_v63, %v246_v17  ;;  %v2325_v31 = vor.u32 %v235_v15, %v234_v53  ;;  %v259_v38 = vsel %vm251_vm11, %v242_v37, %v258_v22  ;;  %v267_v63 = vshrl.u32 %v2350_v44, 16 }
 0x31b   :  { %v262_v18 = vsel %vm252_vm12, %v248_v29, 1326507024  ;;  %v257_v24 = vsel %vm249_vm15, %v2325_v31, %v2327_v36 }
 0x31c   :  { %v263_v40 = vsel %vm251_vm11, %v245_v7, %v262_v18  ;;  %v260_v34 = vsel %vm250_vm10, %v257_v24, %v259_v38 }
 0x31d   :  { %v264_v50 = vsel %vm250_vm10, %v261_v39, %v263_v40  ;;  %v291_v51 = vshrl.u32 %v260_v34, 16  ;;  %v290_v62 = vand.u32 65535, %v260_v34 }
 0x31e   :  { %v269_v56 = vshrl.u32 %v264_v50, 16  ;;  %v268_v15 = vand.u32 65535, %v264_v50 }
 0x31f   :  { %v293_v57 = vmul.u32 %v291_v51, %v266_v55  ;;  %v292_v7 = vmul.u32 %v290_v62, %v266_v55  ;;  %v294_v17 = vmul.u32 %v290_v62, %v267_v63  ;;  %v295_v20 = vmul.u32 %v291_v51, %v267_v63 }
 0x320   :  { %v271_v60 = vmul.u32 %v269_v56, %v266_v55  ;;  %v270_v53 = vmul.u32 %v268_v15, %v266_v55  ;;  %v272_v26 = vmul.u32 %v268_v15, %v267_v63  ;;  %v273_v38 = vmul.u32 %v269_v56, %v267_v63 }
 0x321   :  { %1051 = vrot.lane.b32.xlu1 %v2286_v12, %s1916_s16  ;;  %v296_v58 = vshll.u32 %v293_v57, 16  ;;  %v298_v29 = vshll.u32 %v294_v17, 16  ;;  %v299_v54 = vshrl.u32 %v294_v17, 16  ;;  %v254_v56 = vsel %vm252_vm12, %v242_v37, 2102212464 }
 0x322   :  { %v274_v21 = vshll.u32 %v271_v60, 16  ;;  %v276_v18 = vshll.u32 %v272_v26, 16  ;;  %v277_v63 = vshrl.u32 %v272_v26, 16 }
 0x323   :  { %vm300_vm5 = vc.u32 %v292_v7, %v296_v58  ;;  %v302_v30 = vadd.s32 %v296_v58, %v292_v7  ;;  %v297_v58 = vshrl.u32 %v293_v57, 16 }
 0x324   :  { %vm278_vm4 = vc.u32 %v270_v53, %v274_v21  ;;  %v280_v28 = vadd.s32 %v274_v21, %v270_v53  ;;  %v301_v22 = vsel %vm300_vm5, 1, %v1892_v2  ;;  %v275_v21 = vshrl.u32 %v271_v60, 16 }
 0x325   :  { %vm304_vm9 = vc.u32 %v302_v30, %v298_v29  ;;  %v279_v24 = vsel %vm278_vm4, 1, %v1892_v2  ;;  %v303_v39 = vadd.s32 %v301_v22, %v295_v20  ;;  %vm1046_vm5 = vcmp.lt.s32.totalorder %v2072_v32, 16 }
 0x326   :  { %vm282_vm8 = vc.u32 %v280_v28, %v276_v18  ;;  %v305_v40 = vsel %vm304_vm9, 1, %v1892_v2  ;;  %v281_v34 = vadd.s32 %v279_v24, %v273_v38  ;;  %vm1053_vm4 = vcmp.lt.s32.totalorder %v2072_v32, 112 }
 0x327   :  { %v283_v50 = vsel %vm282_vm8, 1, %v1892_v2  ;;  %v307_v55 = vadd.s32 %v305_v40, %v303_v39  ;;  %v233_v20 = vshrl.u32 %v1893_v16, %v2303_v49  ;;  %vm2860_vm8 = vcmp.eq.s32.totalorder %v2125_v35, 1 }
 0x328   :  { %v285_v15 = vadd.s32 %v283_v50, %v281_v34  ;;  %vm2861_vm9 = vcmp.eq.s32.totalorder %v2109_v19, 1  ;;  %v255_v49 = vsel %vm251_vm11, %v2327_v36, %v254_v56  ;;  %v306_v39 = vadd.s32 %v302_v30, %v298_v29 }
 0x329   :  { %v308_v7 = vadd.s32 %v307_v55, %v297_v58  ;;  %v253_v16 = vsel %vm249_vm15, %v233_v20, %v2325_v31 }
 0x32a   :  { %v286_v53 = vadd.s32 %v285_v15, %v275_v21 }
 0x32b   :  { %v309_v28 = vadd.s32 %v308_v7, %v299_v54 }
 0x32c   :  { %v287_v37 = vadd.s32 %v286_v53, %v277_v63 }
 0x32e   :  { %vm312_vm12 = vc.u32 %v287_v37, %v306_v39  ;;  %v311_v11 = vadd.s32 %v306_v39, %v287_v37 }
 0x372   :  { %v1045_v51 = vpop.permute.xlu2 %1044 }
 0x38a   :  { %v1050_v22 = vpop.permute.xlu0 %1049 }
 0x38b   :  { %v1043_v62 = vpop.permute.xlu1 %1042 }
 0x38c   :  { %v1047_v18 = vsel %vm1046_vm5, %v1043_v62, %v1045_v51  ;;  %v1048_v57 = vsel %vm1046_vm5, %v1045_v51, %v1043_v62 }
 0x393   :  { %v1052_v2 = vpop.permute.xlu1 %1051 }
 0x394   :  { %v1054_v60 = vsel %vm1053_vm4, %v1050_v22, %v1052_v2  ;;  %v1055_v17 = vsel %vm1053_vm4, %v1052_v2, %v1050_v22 }
 0x395   :  { %v1057_v54 = vsel %vm2860_vm8, %v1047_v18, %v1055_v17  ;;  %v1056_v26 = vsel %vm119_vm14, %v1048_v57, %v1054_v60  ;;  %vm218_vm8 = vcmp.le.f32.partialorder %v217_v61, 0.7853982 }
 0x396   :  { %v2381_v24 = vsel %vm114_vm13, %v1057_v54, %v2286_v12  ;;  %v2386_v38 = vsel %vm2861_vm9, %v1056_v26, %v2290_v41  ;;  %v313_v12 = vadd.s32 1, %v309_v28  ;;  %v256_v41 = vsel %vm250_vm10, %v253_v16, %v255_v49 }
 0x397   :  { %1062 = vrot.lane.b32.xlu0 %v2381_v24, %s1917_s17  ;;  %1060 = vrot.lane.b32.xlu2 %v2386_v38, %s1917_s17  ;;  %v310_v31 = vmul.u32 %v2350_v44, %v256_v41  ;;  %vm219_vm10 = vcmp.lt.s32.totalorder %v2300_v42, 0  ;;  %vm1064_vm9 = vcmp.lt.s32.totalorder %v2072_v32, 64 }
 0x398   :  { %v314_v40 = vsel %vm312_vm12, %v313_v12, %v309_v28 }
 0x399   :  { %v315_v34 = vadd.s32 %v314_v40, %v310_v31 }
 0x39b   :  { %v316_v50 = vadd.s32 536870912, %v315_v34 }
 0x39d   :  { %v317_v55 = vshrl.u32 %v316_v50, 30 }
 0x39f   :  { %v318_v36 = vshll.u32 %v317_v55, 30  ;;  %v341_v41 = vsub.s32 4, %v317_v55 }
 0x3a1   :  { %v319_v30 = vsub.s32 %v315_v34, %v318_v36  ;;  %v342_v34 = vsel %vm219_vm10, %v341_v41, %v317_v55 }
 0x3a2   :  { %v344_v36 = vsel %vm218_vm8, 0, %v342_v34 }
 0x3a3   :  { %v321_v29 = vsub.s32 0, %v319_v30  ;;  %vm320_vm11 = vcmp.lt.s32.totalorder %v319_v30, 0 }
 0x3a5   :  { %v322_v62 = vsel %vm320_vm11, %v321_v29, %v319_v30 }
 0x3a6   :  { %v323_v15 = vclz %v322_v62  ;;  %v515_v62 = vadd.s32 3, %v344_v36 }
 0x3a8   :  { %v1657_v58 = vadd.s32 4294967294, %v323_v15 }
 0x3aa   :  { %vm1658_vm15 = vcmp.lt.s32.totalorder %v1657_v58, 0 }
 0x3ab   :  { %v326_v21 = vsel %vm1658_vm15, 0, %v1657_v58  ;;  %v361_v58 = vand.u32 3, %v344_v36 }
 0x3ac   :  { %v331_v7 = vsub.s32 4294967266, %v326_v21  ;;  %v327_v51 = vsub.s32 32, %v326_v21  ;;  %v328_v28 = vshll.u32 %v319_v30, %v326_v21  ;;  %v516_v21 = vand.u32 3, %v515_v62 }
 0x3ad   :  { %vm363_vm12 = vcmp.eq.s32.totalorder %v361_v58, 0  ;;  %vm366_vm15 = vcmp.eq.s32.totalorder %v361_v58, 2 }
 0x3ae   :  { %v332_v53 = vadd.s32 127, %v331_v7  ;;  %v329_v63 = vshrl.u32 %v311_v11, %v327_v51  ;;  %vm518_vm11 = vcmp.eq.s32.totalorder %v516_v21, 0 }
 0x3b0   :  { %v333_v56 = vshll.u32 %v332_v53, 23  ;;  %v330_v22 = vor.u32 %v329_v63, %v328_v28 }
 0x3b2   :  { %v334_v44 = vor.u32 4788187, %v333_v56  ;;  %v337_v18 = vcvt.s32.f32 %v330_v22 }
 0x3b4   :  { %v335_v2 = vand.u32 2147483647, %v334_v44 }
 0x3b6   :  { %v338_v57 = vmul.f32 %v337_v18, %v335_v2 }
 0x3b8   :  { %v339_v60 = vxor.u32 2147483648, %v338_v57 }
 0x3ba   :  { %v340_v17 = vsel %vm219_vm10, %v339_v60, %v338_v57  ;;  %vm521_vm10 = vcmp.eq.s32.totalorder %v516_v21, 2 }
 0x3bb   :  { %v343_v20 = vsel %vm218_vm8, %v2300_v42, %v340_v17  ;;  %vm362_vm8 = vcmp.lt.s32.totalorder %v361_v58, 2 }
 0x3bc   :  { %v345_v54 = vmul.f32 %v343_v20, %v343_v20 }
 0x3be   :  { %v353_v26 = vmul.f32 -0.00019511016, %v345_v54  ;;  %v346_v16 = vmul.f32 -0.001358992, %v345_v54 }
 0x3c0   :  { %v354_v37 = vadd.f32 0.008332121, %v353_v26  ;;  %v347_v39 = vadd.f32 0.041655596, %v346_v16 }
 0x3c2   :  { %v355_v49 = vmul.f32 %v354_v37, %v345_v54  ;;  %v348_v40 = vmul.f32 %v347_v39, %v345_v54 }
 0x3c4   :  { %v356_v12 = vadd.f32 -0.16666654, %v355_v49  ;;  %v349_v50 = vadd.f32 -0.4999988, %v348_v40 }
 0x3c6   :  { %v357_v31 = vmul.f32 %v356_v12, %v345_v54  ;;  %v350_v29 = vmul.f32 %v349_v50, %v345_v54 }
 0x3c8   :  { %v358_v30 = vadd.f32 1.0, %v357_v31  ;;  %v351_v61 = vadd.f32 1.0, %v350_v29 }
 0x3ca   :  { %v359_v15 = vmul.f32 %v358_v30, %v343_v20  ;;  %v367_v28 = vxor.u32 2147483648, %v351_v61 }
 0x3cc   :  { %v364_v51 = vxor.u32 2147483648, %v359_v15  ;;  %v523_v57 = vsel %vm521_vm10, %v367_v28, %v359_v15 }
 0x3ce   :  { %v365_v2 = vsel %vm363_vm12, %v351_v61, %v364_v51  ;;  %v520_v18 = vsel %vm518_vm11, %v351_v61, %v364_v51  ;;  %vm2862_vm12 = vcmp.lt.s32.totalorder %v2072_v32, 126 }
 0x3cf   :  { %vm2863_vm11 = vmmov %vm2862_vm12 }
 0x3f1   :  { %v1061_v7 = vpop.permute.xlu2 %1060 }
 0x409   :  { %v1063_v53 = vpop.permute.xlu0 %1062 }
 0x40a   :  { %v1065_v11 = vsel %vm1064_vm9, %v1061_v7, %v1063_v53  ;;  %v1066_v55 = vsel %vm1064_vm9, %v1063_v53, %v1061_v7 }
 0x40b   :  { %v1068_v56 = vsel %vm2851_vm3, %v1065_v11, %v1066_v55  ;;  %v1067_v63 = vsel %vm2852_vm2, %v1066_v55, %v1065_v11  ;;  %vm517_vm3 = vcmp.lt.s32.totalorder %v516_v21, 2  ;;  %vm360_vm2 = vweird.f32 %v2300_v42 }
 0x40c   :  { %v1070_v44 = vsel %vm126_vm1, %v1068_v56, %v2381_v24  ;;  %v1069_v22 = vsel %vm125_vm0, %v1067_v63, %v2386_v38  ;;  %v368_v24 = vsel %vm366_vm15, %v367_v28, %v359_v15  ;;  %v524_v38 = vsel %vm517_vm3, %v520_v18, %v523_v57 }
 0x40d   :  { %1080 = vrot.lane.b32.xlu2 %v1070_v44, %s1918_s18  ;;  %1071 = vrot.lane.b32.xlu0 %v1069_v22, %s1919_s7  ;;  %v369_v60 = vsel %vm362_vm8, %v365_v2, %v368_v24  ;;  %v2426_v20 = vsel %vm360_vm2, nan, %v524_v38  ;;  %vm2853_vm3 = vcmp.lt.s32.totalorder %v2072_v32, 1  ;;  %vm2864_vm15 = vcmp.lt.s32.totalorder %v2072_v32, 2 }
 0x40e   :  { %1078 = vrot.lane.b32.xlu1 %v1069_v22, %s1918_s18  ;;  %v2424_v17 = vsel %vm360_vm2, nan, %v369_v60  ;;  %vm2854_vm2 = vcmp.lt.s32.totalorder %v2072_v32, 127  ;;  %vm2865_vm10 = vmmov %vm2864_vm15  ;;  %vm2866_vm8 = vcmp.eq.s32.totalorder %v2094_v8, 1 }
 0x415   :  { %1091 = vperm.xlu2 %1723, %v2424_v17   ;;  %1098 = vperm.xlu0 %1724, %v2426_v20  }
 0x416   :  { %1073 = vrot.lane.b32.xlu1 %v1070_v44, %s1919_s7 }
 0x41d   :  { %1725 = vset.pattern.permute.xlu0 %v1891_v1  ;;  %1728 = vset.pattern.permute.xlu2 %v1899_v6 }
 0x41e   :  { %1122 = vperm.xlu0 %1725, %v2424_v17  }
 0x426   :  { %1736 = vset.pattern.permute.xlu0 %v1903_v47 }
 0x467   :  { %v1081_v54 = vpop.permute.xlu2 %1080 }
 0x46f   :  { %v1092_v1 = vpop.permute.xlu2 %1091 }
 0x470   :  { %v1094_v36 = vmul.f32 %v1092_v1, %v1069_v22  ;;  %v1095_v30 = vmul.f32 %v1092_v1, %v1070_v44 }
 0x47f   :  { %v1072_v42 = vpop.permute.xlu0 %1071 }
 0x480   :  { %v1079_v26 = vpop.permute.xlu1 %1078 }
 0x481   :  { %v1083_v37 = vsel %vm2854_vm2, %v1079_v26, %v1081_v54  ;;  %v1084_v16 = vsel %vm2854_vm2, %v1081_v54, %v1079_v26  ;;  %vm2915_vm2 = vcmp.eq.s32.totalorder %v2098_v10, 1 }
 0x482   :  { %v1085_v49 = vsub.f32 0.0, %v1083_v37  ;;  %v1086_v39 = vsub.f32 0.0, %v1084_v16 }
 0x487   :  { %v1099_v31 = vpop.permute.xlu0 %1098 }
 0x488   :  { %v1074_v12 = vpop.permute.xlu1 %1073 }
 0x489   :  { %v1076_v41 = vsel %vm2853_vm3, %v1072_v42, %v1074_v12  ;;  %v1077_v40 = vsel %vm2853_vm3, %v1074_v12, %v1072_v42  ;;  %vm2867_vm3 = vcmp.eq.s32.totalorder %v2098_v10, 1 }
 0x48a   :  { %v1087_v34 = vsel %vm2086_vm6, %v1077_v40, %v1085_v49  ;;  %v1088_v50 = vsel %vm2090_vm7, %v1076_v41, %v1086_v39 }
 0x48b   :  { %v1101_v29 = vmul.f32 %v1099_v31, %v1087_v34  ;;  %v1102_v62 = vmul.f32 %v1099_v31, %v1088_v50 }
 0x48d   :  { %v1104_v15 = vadd.f32 %v1102_v62, %v1095_v30  ;;  %v1103_v61 = vadd.f32 %v1101_v29, %v1094_v36 }
 0x48f   :  { %1113 = vrot.lane.b32.xlu2 %v1104_v15, %s1906_s28  ;;  %1111 = vrot.lane.b32.xlu1 %v1103_v61, %s1906_s28 }
 0x490   :  { %v1123_v63 = vpop.permute.xlu0 %1122 }
 0x491   :  { %v1125_v18 = vmul.f32 %v1123_v63, %v1103_v61  ;;  %v1126_v24 = vmul.f32 %v1123_v63, %v1104_v15 }
 0x497   :  { %1107 = vrot.lane.b32.xlu2 %v1104_v15, %s1905_s3  ;;  %1105 = vrot.lane.b32.xlu1 %v1103_v61, %s1905_s3 }
 0x49f   :  { %1128 = vperm.xlu1 %1726, %v2426_v20  }
 0x4a7   :  { %1727 = vset.pattern.permute.xlu1 %v1899_v6 }
 0x4e9   :  { %v1114_v21 = vpop.permute.xlu2 %1113 }
 0x4f1   :  { %v1108_v11 = vpop.permute.xlu2 %1107 }
 0x501   :  { %v1112_v58 = vpop.permute.xlu1 %1111 }
 0x502   :  { %v1115_v53 = vsel %vm2862_vm12, %v1112_v58, %v1114_v21  ;;  %v1116_v51 = vsel %vm2863_vm11, %v1114_v21, %v1112_v58  ;;  %vm2870_vm11 = vcmp.lt.s32.totalorder %v2072_v32, 4 }
 0x503   :  { %v1117_v28 = vsub.f32 0.0, %v1115_v53  ;;  %v1118_v44 = vsub.f32 0.0, %v1116_v51 }
 0x509   :  { %v1106_v7 = vpop.permute.xlu1 %1105 }
 0x50a   :  { %v1109_v55 = vsel %vm2864_vm15, %v1106_v7, %v1108_v11  ;;  %v1110_v56 = vsel %vm2865_vm10, %v1108_v11, %v1106_v7  ;;  %vm2871_vm15 = vmmov %vm2870_vm11  ;;  %vm2872_vm10 = vcmp.eq.s32.totalorder %v2096_v9, 1 }
 0x50b   :  { %v1119_v6 = vsel %vm2866_vm8, %v1110_v56, %v1117_v28  ;;  %v1120_v22 = vsel %vm2867_vm3, %v1109_v55, %v1118_v44  ;;  %vm2868_vm3 = vcmp.lt.s32.totalorder %v2072_v32, 124  ;;  %vm2873_vm8 = vcmp.eq.s32.totalorder %v2103_v13, 1 }
 0x50c   :  { %vm2869_vm12 = vmmov %vm2868_vm3 }
 0x511   :  { %v1129_v2 = vpop.permute.xlu1 %1128 }
 0x512   :  { %v1131_v57 = vmul.f32 %v1129_v2, %v1119_v6  ;;  %v1132_v60 = vmul.f32 %v1129_v2, %v1120_v22 }
 0x514   :  { %v1133_v38 = vadd.f32 %v1131_v57, %v1125_v18  ;;  %v1134_v54 = vadd.f32 %v1132_v60, %v1126_v24 }
 0x516   :  { %1137 = vrot.lane.b32.xlu0 %v1134_v54, %s1913_s13  ;;  %1143 = vrot.lane.b32.xlu1 %v1134_v54, %s1914_s14 }
 0x517   :  { %1141 = vrot.lane.b32.xlu2 %v1133_v38, %s1914_s14 }
 0x51e   :  { %1152 = vperm.xlu1 %1727, %v2424_v17  }
 0x51f   :  { %1135 = vrot.lane.b32.xlu2 %v1133_v38, %s1913_s13 }
 0x526   :  { %1729 = vset.pattern.permute.xlu1 %v1900_v45 }
 0x527   :  { %1158 = vperm.xlu2 %1728, %v2426_v20  }
 0x52f   :  { %1730 = vset.pattern.permute.xlu2 %v1900_v45 }
 0x571   :  { %v1142_v42 = vpop.permute.xlu2 %1141 }
 0x579   :  { %v1136_v26 = vpop.permute.xlu2 %1135 }
 0x581   :  { %v1159_v34 = vpop.permute.xlu2 %1158 }
 0x588   :  { %v1144_v37 = vpop.permute.xlu1 %1143  ;;  %v1138_v49 = vpop.permute.xlu0 %1137 }
 0x589   :  { %v1145_v16 = vsel %vm2868_vm3, %v1142_v42, %v1144_v37  ;;  %v1146_v1 = vsel %vm2869_vm12, %v1144_v37, %v1142_v42  ;;  %v1139_v41 = vsel %vm2870_vm11, %v1136_v26, %v1138_v49  ;;  %v1140_v40 = vsel %vm2871_vm15, %v1138_v49, %v1136_v26 }
 0x58a   :  { %v1147_v39 = vsub.f32 0.0, %v1145_v16  ;;  %v1148_v12 = vsub.f32 0.0, %v1146_v1  ;;  %vm2874_vm3 = vcmp.lt.s32.totalorder %v2072_v32, 120  ;;  %vm2876_vm11 = vcmp.lt.s32.totalorder %v2072_v32, 8 }
 0x58b   :  { %vm2875_vm12 = vmmov %vm2874_vm3 }
 0x58c   :  { %v1149_v45 = vsel %vm2872_vm10, %v1140_v40, %v1147_v39  ;;  %v1150_v31 = vsel %vm2873_vm8, %v1139_v41, %v1148_v12  ;;  %vm2877_vm15 = vmmov %vm2876_vm11  ;;  %vm2878_vm10 = vcmp.eq.s32.totalorder %v2109_v19, 1  ;;  %vm2879_vm8 = vcmp.eq.s32.totalorder %v2125_v35, 1 }
 0x58d   :  { %v1161_v29 = vmul.f32 %v1159_v34, %v1149_v45  ;;  %v1162_v62 = vmul.f32 %v1159_v34, %v1150_v31 }
 0x590   :  { %v1153_v50 = vpop.permute.xlu1 %1152 }
 0x591   :  { %v1155_v36 = vmul.f32 %v1153_v50, %v1133_v38  ;;  %v1156_v30 = vmul.f32 %v1153_v50, %v1134_v54 }
 0x593   :  { %v1163_v15 = vadd.f32 %v1161_v29, %v1155_v36  ;;  %v1164_v61 = vadd.f32 %v1162_v62, %v1156_v30 }
 0x595   :  { %1173 = vrot.lane.b32.xlu1 %v1164_v61, %s1909_s30  ;;  %1165 = vrot.lane.b32.xlu2 %v1163_v15, %s1908_s29 }
 0x596   :  { %1171 = vrot.lane.b32.xlu0 %v1163_v15, %s1909_s30 }
 0x59d   :  { %1182 = vperm.xlu1 %1729, %v2424_v17   ;;  %1188 = vperm.xlu2 %1730, %v2426_v20  }
 0x59e   :  { %1167 = vrot.lane.b32.xlu0 %v1164_v61, %s1908_s29 }
 0x5a5   :  { %1731 = vset.pattern.permute.xlu1 %v1901_v4  ;;  %1732 = vset.pattern.permute.xlu2 %v1901_v4 }
 0x5ef   :  { %v1166_v21 = vpop.permute.xlu2 %1165 }
 0x5f7   :  { %v1189_v4 = vpop.permute.xlu2 %1188 }
 0x607   :  { %v1174_v58 = vpop.permute.xlu1 %1173 }
 0x608   :  { %v1172_v7 = vpop.permute.xlu0 %1171 }
 0x609   :  { %v1175_v53 = vsel %vm2874_vm3, %v1172_v7, %v1174_v58  ;;  %v1176_v51 = vsel %vm2875_vm12, %v1174_v58, %v1172_v7  ;;  %vm2880_vm3 = vcmp.lt.s32.totalorder %v2072_v32, 96 }
 0x60a   :  { %v1177_v11 = vsub.f32 0.0, %v1175_v53  ;;  %v1178_v55 = vsub.f32 0.0, %v1176_v51  ;;  %vm2881_vm12 = vmmov %vm2880_vm3 }
 0x60f   :  { %v1183_v56 = vpop.permute.xlu1 %1182 }
 0x610   :  { %v1168_v63 = vpop.permute.xlu0 %1167  ;;  %v1185_v2 = vmul.f32 %v1183_v56, %v1163_v15  ;;  %v1186_v18 = vmul.f32 %v1183_v56, %v1164_v61 }
 0x611   :  { %v1169_v28 = vsel %vm2876_vm11, %v1166_v21, %v1168_v63  ;;  %v1170_v44 = vsel %vm2877_vm15, %v1168_v63, %v1166_v21  ;;  %vm2882_vm11 = vcmp.lt.s32.totalorder %v2072_v32, 32 }
 0x612   :  { %v1179_v6 = vsel %vm2878_vm10, %v1170_v44, %v1177_v11  ;;  %v1180_v22 = vsel %vm114_vm13, %v1169_v28, %v1178_v55  ;;  %vm2883_vm15 = vmmov %vm2882_vm11  ;;  %vm2885_vm10 = vcmp.eq.s32.totalorder %v2151_v59, 1 }
 0x613   :  { %v1191_v24 = vmul.f32 %v1189_v4, %v1179_v6  ;;  %v1192_v57 = vmul.f32 %v1189_v4, %v1180_v22 }
 0x615   :  { %v1194_v60 = vadd.f32 %v1192_v57, %v1186_v18  ;;  %v1193_v38 = vadd.f32 %v1191_v24, %v1185_v2  ;;  %v2884_v24 = vmov 8  }
 0x617   :  { %1203 = vrot.lane.b32.xlu1 %v1194_v60, %s1916_s16  ;;  %1195 = vrot.lane.b32.xlu2 %v1193_v38, %s1915_s15 }
 0x618   :  { %1201 = vrot.lane.b32.xlu0 %v1193_v38, %s1916_s16 }
 0x61f   :  { %1212 = vperm.xlu1 %1731, %v2424_v17   ;;  %1218 = vperm.xlu2 %1732, %v2426_v20  }
 0x620   :  { %1197 = vrot.lane.b32.xlu0 %v1194_v60, %s1915_s15 }
 0x627   :  { %1733 = vset.pattern.permute.xlu1 %v1902_v46  ;;  %1734 = vset.pattern.permute.xlu2 %v1902_v46 }
 0x671   :  { %v1196_v42 = vpop.permute.xlu2 %1195 }
 0x679   :  { %v1219_v46 = vpop.permute.xlu2 %1218 }
 0x689   :  { %v1204_v54 = vpop.permute.xlu1 %1203 }
 0x68a   :  { %v1202_v26 = vpop.permute.xlu0 %1201 }
 0x68b   :  { %v1205_v37 = vsel %vm1053_vm4, %v1202_v26, %v1204_v54  ;;  %v1206_v16 = vsel %vm1053_vm4, %v1204_v54, %v1202_v26 }
 0x68c   :  { %v1207_v1 = vsub.f32 0.0, %v1205_v37  ;;  %v1208_v49 = vsub.f32 0.0, %v1206_v16 }
 0x691   :  { %v1213_v39 = vpop.permute.xlu1 %1212 }
 0x692   :  { %v1198_v12 = vpop.permute.xlu0 %1197  ;;  %v1215_v34 = vmul.f32 %v1213_v39, %v1193_v38  ;;  %v1216_v50 = vmul.f32 %v1213_v39, %v1194_v60 }
 0x693   :  { %v1199_v41 = vsel %vm1046_vm5, %v1196_v42, %v1198_v12  ;;  %v1200_v40 = vsel %vm1046_vm5, %v1198_v12, %v1196_v42 }
 0x694   :  { %v1209_v45 = vsel %vm119_vm14, %v1200_v40, %v1207_v1  ;;  %v1210_v31 = vsel %vm2879_vm8, %v1199_v41, %v1208_v49  ;;  %vm2886_vm8 = vcmp.eq.s32.totalorder %v2153_v48, 1 }
 0x695   :  { %v1221_v36 = vmul.f32 %v1219_v46, %v1209_v45  ;;  %v1222_v30 = vmul.f32 %v1219_v46, %v1210_v31 }
 0x697   :  { %v1224_v29 = vadd.f32 %v1222_v30, %v1216_v50  ;;  %v1223_v62 = vadd.f32 %v1221_v36, %v1215_v34 }
 0x699   :  { %1233 = vrot.lane.b32.xlu1 %v1224_v29, %s1912_s12  ;;  %1225 = vrot.lane.b32.xlu2 %v1223_v62, %s1911_s5 }
 0x69a   :  { %1231 = vrot.lane.b32.xlu0 %v1223_v62, %s1912_s12 }
 0x6a1   :  { %1242 = vperm.xlu1 %1733, %v2424_v17   ;;  %1248 = vperm.xlu2 %1734, %v2426_v20  }
 0x6a2   :  { %1227 = vrot.lane.b32.xlu0 %v1224_v29, %s1911_s5 }
 0x6a9   :  { %1735 = vset.pattern.permute.xlu2 %v1903_v47  ;;  %1737 = vset.pattern.permute.xlu1 %v1904_v3 }
 0x6aa   :  { %1266 = vperm.xlu2 %1735, %v2424_v17  }
 0x6b2   :  { %1738 = vset.pattern.permute.xlu2 %v1904_v3 }
 0x6b3   :  { %1290 = vperm.xlu2 %1738, %v2426_v20  }
 0x6bb   :  { %1742 = vset.pattern.permute.xlu2 %v1907_v43 }
 0x6f3   :  { %v1226_v61 = vpop.permute.xlu2 %1225 }
 0x6fb   :  { %v1249_v56 = vpop.permute.xlu2 %1248 }
 0x704   :  { %v1267_v37 = vpop.permute.xlu2 %1266 }
 0x70b   :  { %v1234_v15 = vpop.permute.xlu1 %1233 }
 0x70c   :  { %v1232_v58 = vpop.permute.xlu0 %1231 }
 0x70d   :  { %v1235_v21 = vsel %vm2880_vm3, %v1232_v58, %v1234_v15  ;;  %v1236_v7 = vsel %vm2881_vm12, %v1234_v15, %v1232_v58  ;;  %v1291_v50 = vpop.permute.xlu2 %1290  ;;  %vm2887_vm3 = vcmp.eq.s32.totalorder %v2167_v23, 1  ;;  %vm2888_vm12 = vcmp.eq.s32.totalorder %v2169_v25, 1 }
 0x70e   :  { %v1237_v47 = vsub.f32 0.0, %v1235_v21  ;;  %v1238_v53 = vsub.f32 0.0, %v1236_v7 }
 0x713   :  { %v1243_v51 = vpop.permute.xlu1 %1242 }
 0x714   :  { %v1228_v11 = vpop.permute.xlu0 %1227  ;;  %v1245_v44 = vmul.f32 %v1243_v51, %v1223_v62  ;;  %v1246_v4 = vmul.f32 %v1243_v51, %v1224_v29 }
 0x715   :  { %v1229_v3 = vsel %vm2882_vm11, %v1226_v61, %v1228_v11  ;;  %v1230_v55 = vsel %vm2883_vm15, %v1228_v11, %v1226_v61  ;;  %vm2889_vm11 = vcmp.lt.s32.totalorder %v2072_v32, 2 }
 0x716   :  { %v1239_v63 = vsel %vm125_vm0, %v1230_v55, %v1237_v47  ;;  %v1240_v28 = vsel %vm126_vm1, %v1229_v3, %v1238_v53  ;;  %vm2890_vm15 = vmmov %vm2889_vm11 }
 0x717   :  { %v1251_v6 = vmul.f32 %v1249_v56, %v1239_v63  ;;  %v1252_v22 = vmul.f32 %v1249_v56, %v1240_v28 }
 0x719   :  { %v1254_v2 = vadd.f32 %v1252_v22, %v1246_v4  ;;  %v1253_v18 = vadd.f32 %v1251_v6, %v1245_v44 }
 0x71b   :  { %1257 = vrot.lane.b32.xlu1 %v1254_v2, %s1917_s17  ;;  %1255 = vrot.lane.b32.xlu0 %v1253_v18, %s1917_s17  ;;  %v1270_v39 = vmul.f32 %v1267_v37, %v1254_v2  ;;  %v1269_v12 = vmul.f32 %v1267_v37, %v1253_v18 }
 0x723   :  { %1284 = vperm.xlu1 %1737, %v2424_v17   ;;  %1272 = vperm.xlu0 %1736, %v2426_v20  }
 0x72b   :  { %1740 = vset.pattern.permute.xlu1 %v2884_v24  ;;  %1739 = vset.pattern.permute.xlu0 %v2884_v24 }
 0x78d   :  { %v1258_v57 = vpop.permute.xlu1 %1257  ;;  %v1256_v60 = vpop.permute.xlu0 %1255 }
 0x78e   :  { %v1259_v38 = vsel %vm1064_vm9, %v1256_v60, %v1258_v57  ;;  %v1260_v54 = vsel %vm1064_vm9, %v1258_v57, %v1256_v60 }
 0x78f   :  { %v1261_v42 = vsub.f32 0.0, %v1259_v38  ;;  %v1262_v26 = vsub.f32 0.0, %v1260_v54 }
 0x791   :  { %v1263_v16 = vsel %vm2885_vm10, %v1260_v54, %v1261_v42  ;;  %v1264_v1 = vsel %vm2886_vm8, %v1259_v38, %v1262_v26  ;;  %vm2891_vm10 = vcmp.lt.s32.totalorder %v2072_v32, 126 }
 0x792   :  { %vm2892_vm8 = vmmov %vm2891_vm10 }
 0x795   :  { %v1273_v49 = vpop.permute.xlu0 %1272  ;;  %v1285_v36 = vpop.permute.xlu1 %1284 }
 0x796   :  { %v1275_v41 = vmul.f32 %v1273_v49, %v1263_v16  ;;  %v1276_v40 = vmul.f32 %v1273_v49, %v1264_v1 }
 0x798   :  { %v1277_v46 = vadd.f32 %v1275_v41, %v1269_v12  ;;  %v1278_v45 = vadd.f32 %v1276_v40, %v1270_v39 }
 0x79a   :  { %v1279_v31 = vsub.f32 0.0, %v1278_v45  ;;  %v1280_v34 = vsub.f32 0.0, %v1277_v46  ;;  %v1287_v62 = vmul.f32 %v1285_v36, %v1277_v46  ;;  %v1288_v61 = vmul.f32 %v1285_v36, %v1278_v45 }
 0x79c   :  { %v1281_v30 = vsel %vm2887_vm3, %v1278_v45, %v1279_v31  ;;  %v1282_v29 = vsel %vm2888_vm12, %v1277_v46, %v1280_v34  ;;  %vm2893_vm3 = vcmp.eq.s32.totalorder %v2094_v8, 1  ;;  %vm2894_vm12 = vcmp.eq.s32.totalorder %v2098_v10, 1 }
 0x79d   :  { %v1293_v15 = vmul.f32 %v1291_v50, %v1281_v30  ;;  %v1294_v58 = vmul.f32 %v1291_v50, %v1282_v29 }
 0x79f   :  { %v1295_v21 = vadd.f32 %v1293_v15, %v1287_v62  ;;  %v1296_v7 = vadd.f32 %v1294_v58, %v1288_v61 }
 0x7a1   :  { %1303 = vrot.lane.b32.xlu0 %v1295_v21, %s1906_s28  ;;  %1297 = vrot.lane.b32.xlu1 %v1295_v21, %s1905_s3 }
 0x7a2   :  { %1299 = vrot.lane.b32.xlu2 %v1296_v7, %s1905_s3 }
 0x7a9   :  { %1305 = vrot.lane.b32.xlu1 %v1296_v7, %s1906_s28 }
 0x7fc   :  { %v1300_v53 = vpop.permute.xlu2 %1299 }
 0x813   :  { %v1298_v47 = vpop.permute.xlu1 %1297  ;;  %v1304_v51 = vpop.permute.xlu0 %1303 }
 0x814   :  { %v1301_v3 = vsel %vm2889_vm11, %v1298_v47, %v1300_v53  ;;  %v1302_v55 = vsel %vm2890_vm15, %v1300_v53, %v1298_v47  ;;  %vm2895_vm11 = vcmp.lt.s32.totalorder %v2072_v32, 120 }
 0x815   :  { %vm2896_vm15 = vmmov %vm2895_vm11 }
 0x81b   :  { %v1306_v11 = vpop.permute.xlu1 %1305 }
 0x81c   :  { %v1307_v56 = vsel %vm2891_vm10, %v1304_v51, %v1306_v11  ;;  %v1308_v63 = vsel %vm2892_vm8, %v1306_v11, %v1304_v51  ;;  %vm2897_vm10 = vcmp.lt.s32.totalorder %v2072_v32, 8 }
 0x81d   :  { %v1309_v28 = vsel %vm2893_vm3, %v1302_v55, %v1307_v56  ;;  %v1310_v44 = vsel %vm2894_vm12, %v1301_v3, %v1308_v63  ;;  %vm2898_vm8 = vmmov %vm2897_vm10  ;;  %vm2899_vm3 = vcmp.eq.s32.totalorder %v2109_v19, 1  ;;  %vm2900_vm12 = vcmp.eq.s32.totalorder %v2096_v9, 1 }
 0x81e   :  { %v1311_v4 = vsel %vm2086_vm6, %v1309_v28, %v1295_v21  ;;  %v1312_v6 = vsel %vm2090_vm7, %v1310_v44, %v1296_v7 }
 0x81f   :  { %1319 = vrot.lane.b32.xlu1 %v1311_v4, %s1909_s30  ;;  %1313 = vrot.lane.b32.xlu2 %v1311_v4, %s1908_s29 }
 0x820   :  { %1315 = vrot.lane.b32.xlu0 %v1312_v6, %s1908_s29 }
 0x827   :  { %1321 = vrot.lane.b32.xlu2 %v1312_v6, %s1909_s30 }
 0x879   :  { %v1314_v22 = vpop.permute.xlu2 %1313 }
 0x881   :  { %v1322_v2 = vpop.permute.xlu2 %1321 }
 0x891   :  { %v1320_v18 = vpop.permute.xlu1 %1319 }
 0x892   :  { %v1323_v24 = vsel %vm2895_vm11, %v1320_v18, %v1322_v2  ;;  %v1324_v57 = vsel %vm2896_vm15, %v1322_v2, %v1320_v18  ;;  %v1316_v60 = vpop.permute.xlu0 %1315  ;;  %vm2901_vm11 = vcmp.eq.s32.totalorder %v2103_v13, 1  ;;  %vm2902_vm15 = vcmp.lt.s32.totalorder %v2072_v32, 32 }
 0x893   :  { %v1317_v38 = vsel %vm2897_vm10, %v1314_v22, %v1316_v60  ;;  %v1318_v54 = vsel %vm2898_vm8, %v1316_v60, %v1314_v22  ;;  %vm2903_vm10 = vmmov %vm2902_vm15  ;;  %vm2904_vm8 = vcmp.lt.s32.totalorder %v2072_v32, 96 }
 0x894   :  { %v1325_v42 = vsel %vm2899_vm3, %v1318_v54, %v1323_v24  ;;  %v1326_v26 = vsel %vm114_vm13, %v1317_v38, %v1324_v57  ;;  %vm2905_vm3 = vmmov %vm2904_vm8 }
 0x895   :  { %v1327_v37 = vsel %vm2900_vm12, %v1325_v42, %v1311_v4  ;;  %v1328_v16 = vsel %vm2901_vm11, %v1326_v26, %v1312_v6  ;;  %vm2906_vm12 = vcmp.eq.s32.totalorder %v2125_v35, 1  ;;  %vm2907_vm11 = vcmp.eq.s32.totalorder %v2153_v48, 1 }
 0x896   :  { %1335 = vrot.lane.b32.xlu2 %v1327_v37, %s1912_s12  ;;  %1329 = vrot.lane.b32.xlu0 %v1327_v37, %s1911_s5 }
 0x897   :  { %1331 = vrot.lane.b32.xlu1 %v1328_v16, %s1911_s5 }
 0x89e   :  { %1337 = vrot.lane.b32.xlu0 %v1328_v16, %s1912_s12 }
 0x8f0   :  { %v1336_v39 = vpop.permute.xlu2 %1335 }
 0x908   :  { %v1330_v1 = vpop.permute.xlu0 %1329 }
 0x909   :  { %v1332_v49 = vpop.permute.xlu1 %1331 }
 0x90a   :  { %v1333_v41 = vsel %vm2902_vm15, %v1330_v1, %v1332_v49  ;;  %v1334_v40 = vsel %vm2903_vm10, %v1332_v49, %v1330_v1  ;;  %vm2908_vm15 = vcmp.eq.s32.totalorder %v2151_v59, 1  ;;  %vm2909_vm10 = vcmp.lt.s32.totalorder %v2072_v32, 4 }
 0x910   :  { %v1338_v12 = vpop.permute.xlu0 %1337 }
 0x911   :  { %v1339_v46 = vsel %vm2904_vm8, %v1336_v39, %v1338_v12  ;;  %v1340_v45 = vsel %vm2905_vm3, %v1338_v12, %v1336_v39  ;;  %vm2910_vm8 = vmmov %vm2909_vm10  ;;  %vm2911_vm3 = vcmp.lt.s32.totalorder %v2072_v32, 124 }
 0x912   :  { %v1341_v31 = vsel %vm125_vm0, %v1334_v40, %v1339_v46  ;;  %v1342_v34 = vsel %vm126_vm1, %v1333_v41, %v1340_v45 }
 0x913   :  { %v1343_v50 = vsel %vm119_vm14, %v1341_v31, %v1327_v37  ;;  %v1344_v36 = vsel %vm2906_vm12, %v1342_v34, %v1328_v16  ;;  %vm2912_vm12 = vmmov %vm2911_vm3 }
 0x914   :  { %v1346_v30 = vsel %vm2907_vm11, %v1343_v50, %v1344_v36  ;;  %v1345_v29 = vsel %vm2908_vm15, %v1344_v36, %v1343_v50  ;;  %vm2913_vm11 = vcmp.eq.s32.totalorder %v2103_v13, 1  ;;  %vm2914_vm15 = vcmp.eq.s32.totalorder %v2096_v9, 1 }
 0x915   :  { %1349 = vrot.lane.b32.xlu2 %v1346_v30, %s1913_s13  ;;  %1353 = vrot.lane.b32.xlu0 %v1345_v29, %s1914_s14 }
 0x916   :  { %1347 = vrot.lane.b32.xlu1 %v1345_v29, %s1913_s13 }
 0x91e   :  { %1355 = vrot.lane.b32.xlu1 %v1346_v30, %s1914_s14 }
 0x96f   :  { %v1350_v15 = vpop.permute.xlu2 %1349 }
 0x987   :  { %v1354_v61 = vpop.permute.xlu0 %1353 }
 0x988   :  { %v1348_v62 = vpop.permute.xlu1 %1347 }
 0x989   :  { %v1351_v21 = vsel %vm2909_vm10, %v1348_v62, %v1350_v15  ;;  %v1352_v7 = vsel %vm2910_vm8, %v1350_v15, %v1348_v62  ;;  %vm2916_vm10 = vcmp.eq.s32.totalorder %v2094_v8, 1  ;;  %vm2918_vm8 = vcmp.eq.s32.totalorder %v2109_v19, 1 }
 0x990   :  { %v1356_v58 = vpop.permute.xlu1 %1355 }
 0x991   :  { %v1357_v47 = vsel %vm2911_vm3, %v1354_v61, %v1356_v58  ;;  %v1358_v53 = vsel %vm2912_vm12, %v1356_v58, %v1354_v61  ;;  %vm2919_vm3 = vcmp.eq.s32.totalorder %v2153_v48, 1  ;;  %vm2920_vm12 = vcmp.eq.s32.totalorder %v2151_v59, 1 }
 0x992   :  { %v1360_v51 = vsel %vm2913_vm11, %v1351_v21, %v1358_v53  ;;  %v1359_v11 = vsel %vm2914_vm15, %v1352_v7, %v1357_v47  ;;  %vm2921_vm11 = vcmp.lt.s32.totalorder %v2072_v32, 127 }
 0x993   :  { %v1362_v3 = vsel %vm2915_vm2, %v1360_v51, %v1346_v30  ;;  %v1361_v55 = vsel %vm2916_vm10, %v1359_v11, %v1345_v29  ;;  %vm2917_vm2 = vcmp.eq.s32.totalorder %v2125_v35, 1  ;;  %vm2922_vm15 = vmmov %vm2921_vm11  ;;  %vm2923_vm10 = vcmp.lt.s32.totalorder %v2072_v32, 1 }
 0x994   :  { %1365 = vrot.lane.b32.xlu0 %v1362_v3, %s1915_s15  ;;  %1369 = vrot.lane.b32.xlu1 %v1361_v55, %s1916_s16 }
 0x995   :  { %1363 = vrot.lane.b32.xlu2 %v1361_v55, %s1915_s15 }
 0x99d   :  { %1371 = vrot.lane.b32.xlu2 %v1362_v3, %s1916_s16 }
 0x9ef   :  { %v1364_v56 = vpop.permute.xlu2 %1363 }
 0x9f7   :  { %v1372_v63 = vpop.permute.xlu2 %1371 }
 0xa06   :  { %v1366_v28 = vpop.permute.xlu0 %1365  ;;  %v1370_v44 = vpop.permute.xlu1 %1369 }
 0xa07   :  { %v1367_v4 = vsel %vm1046_vm5, %v1364_v56, %v1366_v28  ;;  %v1368_v6 = vsel %vm1046_vm5, %v1366_v28, %v1364_v56  ;;  %v1373_v22 = vsel %vm1053_vm4, %v1370_v44, %v1372_v63  ;;  %v1374_v2 = vsel %vm1053_vm4, %v1372_v63, %v1370_v44 }
 0xa08   :  { %v1376_v18 = vsel %vm2917_vm2, %v1367_v4, %v1374_v2  ;;  %v1375_v24 = vsel %vm119_vm14, %v1368_v6, %v1373_v22  ;;  %vm2924_vm2 = vmmov %vm2923_vm10 }
 0xa09   :  { %v1378_v57 = vsel %vm114_vm13, %v1376_v18, %v1362_v3  ;;  %v1377_v60 = vsel %vm2918_vm8, %v1375_v24, %v1361_v55  ;;  %vm2927_vm8 = vcmp.lt.s32.totalorder %v2072_v32, 2 }
 0xa0a   :  { %1381 = vrot.lane.b32.xlu1 %v1378_v57, %s1917_s17  ;;  %1379 = vrot.lane.b32.xlu0 %v1377_v60, %s1917_s17 }
 0xa7c   :  { %v1382_v38 = vpop.permute.xlu1 %1381  ;;  %v1380_v54 = vpop.permute.xlu0 %1379 }
 0xa7d   :  { %v1383_v42 = vsel %vm1064_vm9, %v1380_v54, %v1382_v38  ;;  %v1384_v26 = vsel %vm1064_vm9, %v1382_v38, %v1380_v54 }
 0xa7e   :  { %v1386_v37 = vsel %vm2919_vm3, %v1383_v42, %v1384_v26  ;;  %v1385_v16 = vsel %vm2920_vm12, %v1384_v26, %v1383_v42  ;;  %vm2928_vm3 = vmmov %vm2927_vm8  ;;  %vm2929_vm12 = vcmp.eq.s32.totalorder %v2094_v8, 1  ;;  %v1921_v8 = vmov 11  }
 0xa7f   :  { %v1388_v1 = vsel %vm126_vm1, %v1386_v37, %v1378_v57  ;;  %v1387_v49 = vsel %vm125_vm0, %v1385_v16, %v1377_v60 }
 0xa80   :  { %1397 = vrot.lane.b32.xlu0 %v1388_v1, %s1918_s18  ;;  %1389 = vrot.lane.b32.xlu1 %v1387_v49, %s1919_s7 }
 0xa81   :  { %1395 = vrot.lane.b32.xlu2 %v1387_v49, %s1918_s18 }
 0xa88   :  { %1406 = vperm.xlu0 %1739, %v2424_v17   ;;  %1412 = vperm.xlu1 %1740, %v2426_v20  }
 0xa89   :  { %1391 = vrot.lane.b32.xlu2 %v1388_v1, %s1919_s7 }
 0xa90   :  { %1741 = vset.pattern.permute.xlu1 %v1907_v43  ;;  %1752 = vset.pattern.permute.xlu0 %v1924_v27 }
 0xadb   :  { %v1396_v39 = vpop.permute.xlu2 %1395 }
 0xae3   :  { %v1392_v34 = vpop.permute.xlu2 %1391 }
 0xaf2   :  { %v1398_v12 = vpop.permute.xlu0 %1397  ;;  %v1390_v41 = vpop.permute.xlu1 %1389 }
 0xaf3   :  { %v1399_v40 = vsel %vm2921_vm11, %v1396_v39, %v1398_v12  ;;  %v1400_v46 = vsel %vm2922_vm15, %v1398_v12, %v1396_v39  ;;  %v1393_v50 = vsel %vm2923_vm10, %v1390_v41, %v1392_v34  ;;  %v1394_v36 = vsel %vm2924_vm2, %v1392_v34, %v1390_v41 }
 0xaf4   :  { %v1401_v45 = vsub.f32 0.0, %v1399_v40  ;;  %v1402_v31 = vsub.f32 0.0, %v1400_v46  ;;  %vm2930_vm11 = vcmp.eq.s32.totalorder %v2098_v10, 1  ;;  %vm2931_vm15 = vcmp.lt.s32.totalorder %v2072_v32, 124 }
 0xaf5   :  { %vm2932_vm10 = vmmov %vm2931_vm15  ;;  %vm2933_vm2 = vcmp.lt.s32.totalorder %v2072_v32, 4 }
 0xaf6   :  { %v1403_v29 = vsel %vm2086_vm6, %v1394_v36, %v1401_v45  ;;  %v1404_v62 = vsel %vm2090_vm7, %v1393_v50, %v1402_v31  ;;  %vm2925_vm6 = vcmp.lt.s32.totalorder %v2072_v32, 126 }
 0xaf7   :  { %vm2926_vm7 = vmmov %vm2925_vm6 }
 0xafa   :  { %v1407_v30 = vpop.permute.xlu0 %1406  ;;  %v1413_v43 = vpop.permute.xlu1 %1412 }
 0xafb   :  { %v1409_v15 = vmul.f32 %v1407_v30, %v1387_v49  ;;  %v1410_v61 = vmul.f32 %v1407_v30, %v1388_v1  ;;  %v1415_v58 = vmul.f32 %v1413_v43, %v1403_v29  ;;  %v1416_v21 = vmul.f32 %v1413_v43, %v1404_v62 }
 0xafd   :  { %v1417_v7 = vadd.f32 %v1415_v58, %v1409_v15  ;;  %v1418_v47 = vadd.f32 %v1416_v21, %v1410_v61 }
 0xaff   :  { %1421 = vrot.lane.b32.xlu0 %v1418_v47, %s1905_s3  ;;  %1427 = vrot.lane.b32.xlu1 %v1418_v47, %s1906_s28 }
 0xb00   :  { %1425 = vrot.lane.b32.xlu2 %v1417_v7, %s1906_s28 }
 0xb07   :  { %1436 = vperm.xlu1 %1741, %v2424_v17  }
 0xb08   :  { %1419 = vrot.lane.b32.xlu2 %v1417_v7, %s1905_s3 }
 0xb0f   :  { %1743 = vset.pattern.permute.xlu1 %v1920_v0 }
 0xb10   :  { %1442 = vperm.xlu2 %1742, %v2426_v20  }
 0xb18   :  { %1744 = vset.pattern.permute.xlu2 %v1920_v0 }
 0xb5a   :  { %v1426_v5 = vpop.permute.xlu2 %1425 }
 0xb62   :  { %v1420_v53 = vpop.permute.xlu2 %1419 }
 0xb6a   :  { %v1443_v22 = vpop.permute.xlu2 %1442 }
 0xb71   :  { %v1428_v51 = vpop.permute.xlu1 %1427  ;;  %v1422_v55 = vpop.permute.xlu0 %1421 }
 0xb72   :  { %v1429_v11 = vsel %vm2925_vm6, %v1426_v5, %v1428_v51  ;;  %v1430_v3 = vsel %vm2926_vm7, %v1428_v51, %v1426_v5  ;;  %v1423_v28 = vsel %vm2927_vm8, %v1420_v53, %v1422_v55  ;;  %v1424_v44 = vsel %vm2928_vm3, %v1422_v55, %v1420_v53  ;;  %vm2934_vm6 = vmmov %vm2933_vm2 }
 0xb73   :  { %v1431_v56 = vsub.f32 0.0, %v1429_v11  ;;  %v1432_v63 = vsub.f32 0.0, %v1430_v3  ;;  %vm2935_vm7 = vcmp.eq.s32.totalorder %v2096_v9, 1  ;;  %vm2936_vm8 = vcmp.eq.s32.totalorder %v2103_v13, 1 }
 0xb74   :  { %v1922_v9 = vmov 12   ;;  %vm2937_vm3 = vcmp.lt.s32.totalorder %v2072_v32, 120 }
 0xb75   :  { %v1433_v4 = vsel %vm2929_vm12, %v1424_v44, %v1431_v56  ;;  %v1434_v6 = vsel %vm2930_vm11, %v1423_v28, %v1432_v63  ;;  %vm2938_vm12 = vmmov %vm2937_vm3  ;;  %vm2939_vm11 = vcmp.lt.s32.totalorder %v2072_v32, 8 }
 0xb76   :  { %v1445_v57 = vmul.f32 %v1443_v22, %v1433_v4  ;;  %v1446_v60 = vmul.f32 %v1443_v22, %v1434_v6 }
 0xb79   :  { %v1437_v2 = vpop.permute.xlu1 %1436 }
 0xb7a   :  { %v1439_v18 = vmul.f32 %v1437_v2, %v1417_v7  ;;  %v1440_v24 = vmul.f32 %v1437_v2, %v1418_v47 }
 0xb7c   :  { %v1447_v38 = vadd.f32 %v1445_v57, %v1439_v18  ;;  %v1448_v54 = vadd.f32 %v1446_v60, %v1440_v24 }
 0xb7e   :  { %1457 = vrot.lane.b32.xlu1 %v1448_v54, %s1914_s14  ;;  %1449 = vrot.lane.b32.xlu2 %v1447_v38, %s1913_s13 }
 0xb7f   :  { %1455 = vrot.lane.b32.xlu0 %v1447_v38, %s1914_s14 }
 0xb86   :  { %1466 = vperm.xlu1 %1743, %v2424_v17   ;;  %1472 = vperm.xlu2 %1744, %v2426_v20  }
 0xb87   :  { %1451 = vrot.lane.b32.xlu0 %v1448_v54, %s1913_s13 }
 0xb8e   :  { %1745 = vset.pattern.permute.xlu1 %v1921_v8  ;;  %1746 = vset.pattern.permute.xlu2 %v1921_v8 }
 0xbd8   :  { %v1450_v42 = vpop.permute.xlu2 %1449 }
 0xbe0   :  { %v1473_v46 = vpop.permute.xlu2 %1472 }
 0xbf0   :  { %v1458_v10 = vpop.permute.xlu1 %1457 }
 0xbf1   :  { %v1456_v26 = vpop.permute.xlu0 %1455 }
 0xbf2   :  { %v1459_v37 = vsel %vm2931_vm15, %v1456_v26, %v1458_v10  ;;  %v1460_v16 = vsel %vm2932_vm10, %v1458_v10, %v1456_v26  ;;  %vm2940_vm15 = vmmov %vm2939_vm11  ;;  %vm2941_vm10 = vcmp.eq.s32.totalorder %v2109_v19, 1  ;;  %v1923_v19 = vmov 13  }
 0xbf3   :  { %v1461_v1 = vsub.f32 0.0, %v1459_v37  ;;  %v1462_v49 = vsub.f32 0.0, %v1460_v16 }
 0xbf8   :  { %v1467_v39 = vpop.permute.xlu1 %1466 }
 0xbf9   :  { %v1452_v12 = vpop.permute.xlu0 %1451  ;;  %v1469_v34 = vmul.f32 %v1467_v39, %v1447_v38  ;;  %v1470_v50 = vmul.f32 %v1467_v39, %v1448_v54 }
 0xbfa   :  { %v1453_v41 = vsel %vm2933_vm2, %v1450_v42, %v1452_v12  ;;  %v1454_v40 = vsel %vm2934_vm6, %v1452_v12, %v1450_v42  ;;  %vm2950_vm6 = vcmp.eq.s32.totalorder %v2169_v25, 1 }
 0xbfb   :  { %v1463_v45 = vsel %vm2935_vm7, %v1454_v40, %v1461_v1  ;;  %v1464_v31 = vsel %vm2936_vm8, %v1453_v41, %v1462_v49  ;;  %vm1629_vm7 = vcmask 7168  }
 0xbfc   :  { %v1475_v36 = vmul.f32 %v1473_v46, %v1463_v45  ;;  %v1476_v30 = vmul.f32 %v1473_v46, %v1464_v31 }
 0xbfe   :  { %v1478_v43 = vadd.f32 %v1476_v30, %v1470_v50  ;;  %v1477_v29 = vadd.f32 %v1475_v36, %v1469_v34 }
 0xc00   :  { %1487 = vrot.lane.b32.xlu1 %v1478_v43, %s1909_s30  ;;  %1479 = vrot.lane.b32.xlu2 %v1477_v29, %s1908_s29 }
 0xc01   :  { %1485 = vrot.lane.b32.xlu0 %v1477_v29, %s1909_s30 }
 0xc08   :  { %1496 = vperm.xlu1 %1745, %v2424_v17   ;;  %1502 = vperm.xlu2 %1746, %v2426_v20  }
 0xc09   :  { %1481 = vrot.lane.b32.xlu0 %v1478_v43, %s1908_s29 }
 0xc10   :  { %1747 = vset.pattern.permute.xlu1 %v1922_v9  ;;  %1748 = vset.pattern.permute.xlu2 %v1922_v9 }
 0xc5a   :  { %v1480_v62 = vpop.permute.xlu2 %1479 }
 0xc62   :  { %v1503_v51 = vpop.permute.xlu2 %1502 }
 0xc72   :  { %v1488_v13 = vpop.permute.xlu1 %1487 }
 0xc73   :  { %v1486_v15 = vpop.permute.xlu0 %1485 }
 0xc74   :  { %v1489_v61 = vsel %vm2937_vm3, %v1486_v15, %v1488_v13  ;;  %v1490_v58 = vsel %vm2938_vm12, %v1488_v13, %v1486_v15 }
 0xc75   :  { %v1491_v21 = vsub.f32 0.0, %v1489_v61  ;;  %v1492_v7 = vsub.f32 0.0, %v1490_v58 }
 0xc7a   :  { %v1497_v47 = vpop.permute.xlu1 %1496 }
 0xc7b   :  { %v1482_v0 = vpop.permute.xlu0 %1481  ;;  %v1499_v55 = vmul.f32 %v1497_v47, %v1477_v29  ;;  %v1500_v56 = vmul.f32 %v1497_v47, %v1478_v43 }
 0xc7c   :  { %v1483_v5 = vsel %vm2939_vm11, %v1480_v62, %v1482_v0  ;;  %v1484_v53 = vsel %vm2940_vm15, %v1482_v0, %v1480_v62 }
 0xc7d   :  { %v1493_v11 = vsel %vm2941_vm10, %v1484_v53, %v1491_v21  ;;  %v1494_v3 = vsel %vm114_vm13, %v1483_v5, %v1492_v7  ;;  %vm2942_vm13 = vcmp.eq.s32.totalorder %v2125_v35, 1 }
 0xc7e   :  { %v1505_v63 = vmul.f32 %v1503_v51, %v1493_v11  ;;  %v1506_v28 = vmul.f32 %v1503_v51, %v1494_v3 }
 0xc80   :  { %v1508_v44 = vadd.f32 %v1506_v28, %v1500_v56  ;;  %v1507_v4 = vadd.f32 %v1505_v63, %v1499_v55 }
 0xc82   :  { %1517 = vrot.lane.b32.xlu1 %v1508_v44, %s1916_s16  ;;  %1509 = vrot.lane.b32.xlu2 %v1507_v4, %s1915_s15 }
 0xc83   :  { %1515 = vrot.lane.b32.xlu0 %v1507_v4, %s1916_s16 }
 0xc8a   :  { %1526 = vperm.xlu1 %1747, %v2424_v17   ;;  %1532 = vperm.xlu2 %1748, %v2426_v20  }
 0xc8b   :  { %1511 = vrot.lane.b32.xlu0 %v1508_v44, %s1915_s15 }
 0xc92   :  { %1749 = vset.pattern.permute.xlu1 %v1923_v19  ;;  %1750 = vset.pattern.permute.xlu2 %v1923_v19 }
 0xcdc   :  { %v1510_v22 = vpop.permute.xlu2 %1509 }
 0xce4   :  { %v1533_v42 = vpop.permute.xlu2 %1532 }
 0xcf4   :  { %v1518_v6 = vpop.permute.xlu1 %1517 }
 0xcf5   :  { %v1516_v2 = vpop.permute.xlu0 %1515 }
 0xcf6   :  { %v1519_v18 = vsel %vm1053_vm4, %v1516_v2, %v1518_v6  ;;  %v1520_v24 = vsel %vm1053_vm4, %v1518_v6, %v1516_v2  ;;  %vm2945_vm4 = vcmp.lt.s32.totalorder %v2072_v32, 32 }
 0xcf7   :  { %v1521_v57 = vsub.f32 0.0, %v1519_v18  ;;  %v1522_v60 = vsub.f32 0.0, %v1520_v24  ;;  %vm2946_vm2 = vmmov %vm2945_vm4 }
 0xcfc   :  { %v1527_v38 = vpop.permute.xlu1 %1526 }
 0xcfd   :  { %v1512_v54 = vpop.permute.xlu0 %1511  ;;  %v1529_v16 = vmul.f32 %v1527_v38, %v1507_v4  ;;  %v1530_v1 = vmul.f32 %v1527_v38, %v1508_v44 }
 0xcfe   :  { %v1513_v8 = vsel %vm1046_vm5, %v1510_v22, %v1512_v54  ;;  %v1514_v10 = vsel %vm1046_vm5, %v1512_v54, %v1510_v22  ;;  %v1613_v22 = vld [vmem:[%s2829_s6] sm:$0x3] }
 0xcff   :  { %v1523_v26 = vsel %vm119_vm14, %v1514_v10, %v1521_v57  ;;  %v1524_v37 = vsel %vm2942_vm13, %v1513_v8, %v1522_v60  ;;  %vm2943_vm14 = vcmp.lt.s32.totalorder %v2072_v32, 96  ;;  %v1615_v54 = vperm.slane %v1613_v22, 0 }
 0xd00   :  { %v1535_v49 = vmul.f32 %v1533_v42, %v1523_v26  ;;  %v1536_v39 = vmul.f32 %v1533_v42, %v1524_v37  ;;  %vm2944_vm5 = vmmov %vm2943_vm14  ;;  %v1616_v8 = vperm.slane %v1613_v22, 1  ;;  %v1758_v37 = vld [vmem:[#allocation2] ss:$0 sm:$0xff] }
 0xd02   :  { %v1538_v12 = vadd.f32 %v1536_v39, %v1530_v1  ;;  %v1537_v41 = vadd.f32 %v1535_v49, %v1529_v16 }
 0xd04   :  { %1547 = vrot.lane.b32.xlu1 %v1538_v12, %s1912_s12  ;;  %1539 = vrot.lane.b32.xlu2 %v1537_v41, %s1911_s5 }
 0xd05   :  { %1545 = vrot.lane.b32.xlu0 %v1537_v41, %s1912_s12 }
 0xd0c   :  { %1556 = vperm.xlu1 %1749, %v2424_v17   ;;  %1562 = vperm.xlu2 %1750, %v2426_v20  }
 0xd0d   :  { %1541 = vrot.lane.b32.xlu0 %v1538_v12, %s1911_s5 }
 0xd14   :  { %1751 = vset.pattern.permute.xlu2 %v1924_v27  ;;  %1753 = vset.pattern.permute.xlu1 %v1925_v33 }
 0xd15   :  { %1580 = vperm.xlu2 %1751, %v2424_v17  }
 0xd1d   :  { %1754 = vset.pattern.permute.xlu2 %v1925_v33 }
 0xd1e   :  { %1604 = vperm.xlu2 %1754, %v2426_v20  }
 0xd5e   :  { %v1540_v40 = vpop.permute.xlu2 %1539 }
 0xd66   :  { %v1563_v9 = vpop.permute.xlu2 %1562 }
 0xd6f   :  { %v1581_v11 = vpop.permute.xlu2 %1580 }
 0xd76   :  { %v1548_v35 = vpop.permute.xlu1 %1547 }
 0xd77   :  { %v1546_v46 = vpop.permute.xlu0 %1545 }
 0xd78   :  { %v1549_v45 = vsel %vm2943_vm14, %v1546_v46, %v1548_v35  ;;  %v1550_v31 = vsel %vm2944_vm5, %v1548_v35, %v1546_v46  ;;  %v1605_v32 = vpop.permute.xlu2 %1604 }
 0xd79   :  { %v1551_v34 = vsub.f32 0.0, %v1549_v45  ;;  %v1552_v50 = vsub.f32 0.0, %v1550_v31 }
 0xd7e   :  { %v1557_v36 = vpop.permute.xlu1 %1556 }
 0xd7f   :  { %v1542_v30 = vpop.permute.xlu0 %1541  ;;  %v1559_v15 = vmul.f32 %v1557_v36, %v1537_v41  ;;  %v1560_v61 = vmul.f32 %v1557_v36, %v1538_v12 }
 0xd80   :  { %v1543_v43 = vsel %vm2945_vm4, %v1540_v40, %v1542_v30  ;;  %v1544_v29 = vsel %vm2946_vm2, %v1542_v30, %v1540_v40 }
 0xd81   :  { %v1553_v13 = vsel %vm125_vm0, %v1544_v29, %v1551_v34  ;;  %v1554_v62 = vsel %vm126_vm1, %v1543_v43, %v1552_v50  ;;  %vm2947_vm0 = vcmp.eq.s32.totalorder %v2151_v59, 1  ;;  %vm2948_vm1 = vcmp.eq.s32.totalorder %v2153_v48, 1 }
 0xd82   :  { %v1565_v58 = vmul.f32 %v1563_v9, %v1553_v13  ;;  %v1566_v21 = vmul.f32 %v1563_v9, %v1554_v62 }
 0xd84   :  { %v1568_v7 = vadd.f32 %v1566_v21, %v1560_v61  ;;  %v1567_v47 = vadd.f32 %v1565_v58, %v1559_v15 }
 0xd86   :  { %1571 = vrot.lane.b32.xlu1 %v1568_v7, %s1917_s17  ;;  %1569 = vrot.lane.b32.xlu0 %v1567_v47, %s1917_s17  ;;  %v1583_v56 = vmul.f32 %v1581_v11, %v1567_v47 }
 0xd8e   :  { %1598 = vperm.xlu1 %1753, %v2424_v17   ;;  %1586 = vperm.xlu0 %1752, %v2426_v20   ;;  %v1584_v20 = vmul.f32 %v1581_v11, %v1568_v7 }
 0xd96   :  { %1755 = vset.pattern.permute.xlu0 %v1925_v33 }
 0xdf8   :  { %v1572_v14 = vpop.permute.xlu1 %1571  ;;  %v1570_v0 = vpop.permute.xlu0 %1569 }
 0xdf9   :  { %v1573_v52 = vsel %vm1064_vm9, %v1570_v0, %v1572_v14  ;;  %v1574_v5 = vsel %vm1064_vm9, %v1572_v14, %v1570_v0  ;;  %vm2949_vm9 = vcmp.eq.s32.totalorder %v2167_v23, 1 }
 0xdfa   :  { %v1575_v53 = vsub.f32 0.0, %v1573_v52  ;;  %v1576_v51 = vsub.f32 0.0, %v1574_v5 }
 0xdfc   :  { %v1577_v3 = vsel %vm2947_vm0, %v1574_v5, %v1575_v53  ;;  %v1578_v17 = vsel %vm2948_vm1, %v1573_v52, %v1576_v51 }
 0xe00   :  { %v1587_v55 = vpop.permute.xlu0 %1586  ;;  %v1599_v59 = vpop.permute.xlu1 %1598 }
 0xe01   :  { %v1589_v63 = vmul.f32 %v1587_v55, %v1577_v3  ;;  %v1590_v28 = vmul.f32 %v1587_v55, %v1578_v17 }
 0xe03   :  { %v1591_v44 = vadd.f32 %v1589_v63, %v1583_v56  ;;  %v1592_v4 = vadd.f32 %v1590_v28, %v1584_v20 }
 0xe05   :  { %v1593_v19 = vsub.f32 0.0, %v1592_v4  ;;  %v1594_v27 = vsub.f32 0.0, %v1591_v44  ;;  %v1601_v2 = vmul.f32 %v1599_v59, %v1591_v44  ;;  %v1602_v18 = vmul.f32 %v1599_v59, %v1592_v4 }
 0xe07   :  { %v1595_v48 = vsel %vm2949_vm9, %v1592_v4, %v1593_v19  ;;  %v1596_v6 = vsel %vm2950_vm6, %v1591_v44, %v1594_v27 }
 0xe08   :  { %v1607_v24 = vmul.f32 %v1605_v32, %v1595_v48  ;;  %v1608_v57 = vmul.f32 %v1605_v32, %v1596_v6 }
 0xe0a   :  { %v1609_v60 = vadd.f32 %v1607_v24, %v1601_v2  ;;  %v1610_v38 = vadd.f32 %v1608_v57, %v1602_v18 }
 0xe0c   :  { %v1611_v23 = vmul.f32 %v1609_v60, %v1609_v60  ;;  %v1612_v10 = vmul.f32 %v1610_v38, %v1610_v38 }
 0xe0e   :  { %v1619_v42 = vmul.f32 %v1615_v54, %v1611_v23  ;;  %v1620_v25 = vmul.f32 %v1616_v8, %v1612_v10 }
 0xe10   :  { %v1621_v26 = vadd.f32 %v1620_v25, %v1619_v42 }
 0xe12   :  { %1622 = vadd.xlane.f32.xlu1 %v1621_v26 }
 0xe85   :  { %v1623_v16 = vpop.xlane.xlu1 %1622 }
 0xe86   :  { %v1628_v1 = vadd.f32 %v1758_v37, %v1623_v16 }
 0xe88   :  { %1630 = vst.msk [vmem:[%s2831_s8] sm:$0xff] %vm1629_vm7, %v1628_v1 }
 0xe89   :  { %1885 = dma.done.wait [#allocation5], 128  }
 0xe8a   :  { %1886 = vsyncadd [#allocation5], 4294967168 }
 0xe8b   :  { %1650 = vsyncpa [#allocation4], 1 }
 0xe8c   :  { %1651 = vsyncpa [#allocation7], 1 }
 0xe8d   :  { %1652 = vsyncpa [#allocation10], 1 }
 0xe8e   :  { %1653 = vsyncpa [#allocation5], 1 }

</bundles_post_ra>
